<compile_context>
chip_gen: v7x
topology: tpu7x:2x2x1
jax: 0.10.0
libtpu: 0.0.40
codegen_flags: <defaults>
</compile_context>

<pallas_src>
import functools

import jax
import jax.numpy as jnp
from jax import lax
from jax.experimental import pallas as pl
from jax.experimental.pallas import tpu as pltpu


# ----------------------------------------------------------------------------
# Deterministic stand-in for MODEL_PARAM_DICT['sac']['param_range']
# (standard SAC-SMA ranges; the original dict is not shipped with the module).
# ----------------------------------------------------------------------------
SAC_PARAM_NAMES = [
    "KC", "PCTIM", "ADIMP", "UZTWM", "UZFWM", "LZTWM", "LZFSM", "LZFPM",
    "RSERV", "PFREE", "RIVA", "ZPERC", "REXP", "UZK", "LZSK", "LZPK",
    "CI", "CGS", "CGP", "KE", "XE",
]
SAC_PARAM_RANGE = {
    "KC":    (0.1, 1.2),
    "PCTIM": (0.0, 0.1),
    "ADIMP": (0.0, 0.3),
    "UZTWM": (10.0, 300.0),
    "UZFWM": (5.0, 150.0),
    "LZTWM": (10.0, 500.0),
    "LZFSM": (5.0, 400.0),
    "LZFPM": (10.0, 1000.0),
    "RSERV": (0.0, 0.4),
    "PFREE": (0.0, 0.6),
    "RIVA":  (0.0, 0.3),
    "ZPERC": (1.0, 250.0),
    "REXP":  (1.1, 5.0),
    "UZK":   (0.1, 0.75),
    "LZSK":  (0.01, 0.35),
    "LZPK":  (0.001, 0.05),
    "CI":    (0.0, 0.9),
    "CGS":   (0.95, 0.998),
    "CGP":   (0.98, 0.998),
    "KE":    (0.0, 1.0),
    "XE":    (0.0, 0.5),
}

HYDRODT = 1.0            # hours-per-step factor from the module
RSNPB = 1                # river segments per basin (rivernumber == 1 everywhere)

_LANE = 128
_SUBL = 8
_TILE_B = _SUBL * _LANE  # 1024 basins per basin-block -> full (8,128) vregs
_MAX_TILE_T = 512        # sized so 2x(in+out) blocks ~ 17 MiB (fits v7x 64 MiB VMEM)
_UNROLL = 2              # modest manual unroll of the recurrence


def _round_up(x, m):
    return -(-x // m) * m


def _make_sac_kernel(tile_t, t_total):
    """Builds the fused water-balance + Muskingum routing recurrence kernel."""
    mask_tail = (t_total % tile_t) != 0

    def kernel(prcp_ref, pet_ref, pars_ref, state0_ref,
               qsim_ref, esim_ref, state_out_ref, state_scr):
        t_idx = pl.program_id(1)

        @pl.when(t_idx == 0)
        def _():
            state_scr[...] = state0_ref[...]

        # ---- physically-scaled parameters, one (8,128) slab each ----
        kc    = pars_ref[0]
        pctim = pars_ref[1]
        adimp = pars_ref[2]
        uztwm = pars_ref[3]
        uzfwm = pars_ref[4]
        lztwm = pars_ref[5]
        lzfsm = pars_ref[6]
        lzfpm = pars_ref[7]
        rserv = pars_ref[8]
        pfree = pars_ref[9]
        riva  = pars_ref[10]
        zperc = pars_ref[11]
        rexp  = pars_ref[12]
        uzk   = pars_ref[13]
        lzsk  = pars_ref[14]
        lzpk  = pars_ref[15]
        ci    = pars_ref[16]
        cgs   = pars_ref[17]
        cgp   = pars_ref[18]
        ke    = pars_ref[19]
        xe    = pars_ref[20]

        # ---- loop-invariant constants (all divides happen once per block) ----
        r_uztwm  = 1.0 / uztwm
        r_lztwm  = 1.0 / lztwm
        r_uzfwm  = 1.0 / uzfwm
        sum_uz   = uztwm + uzfwm
        r_sum_uz = 1.0 / sum_uz
        r_uz_lz  = 1.0 / (uztwm + lztwm)
        sum_fsp  = lzfsm + lzfpm
        sum_lz3  = sum_fsp + lztwm
        r_lz3    = 1.0 / sum_lz3
        pbase    = lzfsm * lzsk + lzfpm * lzpk
        saved    = rserv * sum_fsp
        r_ratio  = 1.0 / (sum_fsp - saved + lztwm)
        # coef: the source's (1 - lzfsm/lzfsm) term is identically 0, so its
        # dynamic factor 2*(1-lzfp/lzfpm)/(1-lzfp/lzfpm) == 2 wherever defined;
        # this loop-invariant form also removes the 0/0 NaN hazard when
        # lzfp == lzfpm (there percp is forced to 0 by the min() anyway).
        coef     = jnp.clip(2.0 * lzfpm / sum_fsp, 0.0, 1.0)
        parea1   = 1.0 - pctim - adimp          # unclamped (rs and u)
        parea2   = jnp.maximum(parea1, 0.0)     # clamped (routing)
        u        = parea1 * 1000.0
        adimp2   = adimp * adimp                # verbatim adimp^2 weighting
        ci_u     = (1.0 - ci) * u
        cgs_u    = (1.0 - cgs) * u
        cgp_u    = (1.0 - cgp) * u
        # Muskingum routing coefficients (rivernumber == 1, hydrodt == 1).
        dt = HYDRODT * 24.0 / 2.0
        ko = ke * (24.0 / float(RSNPB))
        xo = xe
        c1  = jnp.maximum(ko * (1.0 - xo) + dt, 0.0)
        c2  = jnp.maximum((-ko * xo + dt) / c1, 0.0)
        c3  = jnp.maximum((ko * (1.0 - xo) - dt) / c1, 0.0)
        c1_ = (ko * xo + dt) / c1

        base = t_idx * tile_t

        def step(i, carry):
            (auztw, alztw, uztw, uzfw, lztw, lzfs, lzfp,
             qs, qi, qgs, qgp, mq) = carry

            p = jnp.maximum(prcp_ref[i], 0.0)
            e = pet_ref[i]
            e = jnp.where(jnp.isnan(e) | jnp.isinf(e), 0.0, e)  # nan_to_num(0,0,0)
            e = jnp.maximum(e, 0.0)
            ep = kc * e

            # ----- impervious / alterable-impervious area -----
            roimp = pctim * p
            ae2 = pctim * ep
            ae1 = jnp.minimum(auztw, ep * (auztw * r_uztwm))
            ae3 = jnp.maximum((ep - ae1) * (alztw * r_uz_lz), 0.0)
            pav = jnp.maximum(p - (uztwm - (auztw - ae1)), 0.0)
            adsur = jnp.maximum(pav * ((alztw - ae3) * r_lztwm), 0.0)
            ars = jnp.maximum(pav - adsur + (alztw - ae3) - lztwm, 0.0)
            auztw_n = jnp.maximum(jnp.minimum(uztwm, auztw - ae1 + p), 0.0)
            alztw_n = jnp.maximum(jnp.minimum(lztwm, pav - adsur + (alztw - ae3)), 0.0)

            # ----- evaporation on the permeable area -----
            e1 = jnp.minimum(uztw, ep * (uztw * r_uztwm))
            e2 = jnp.maximum(jnp.minimum(uzfw, ep - e1), 0.0)
            e3 = jnp.maximum((ep - e1 - e2) * (lztw * r_uz_lz), 0.0)
            lt1 = jnp.maximum(lztw - e3, 0.0)
            e4 = riva * ep
            et = ae2 + ae1 + ae3 + e1 + e2 + e3 + e4

            # ----- surface runoff / upper-zone update -----
            rs = jnp.maximum(p + (uztw + uzfw - e1 - e2) - sum_uz, 0.0) * parea1
            ut = jnp.maximum(jnp.minimum(uztwm, uztw - e1 + p), 0.0)
            uf = jnp.maximum(jnp.minimum(uzfwm, p + (uztw + uzfw - e1 - e2) - ut), 0.0)
            ri = uf * uzk
            uf = jnp.maximum(uf - ri, 0.0)

            # ----- percolation -----
            defr = jnp.maximum(1.0 - (lzfs + lzfp + lt1) * r_lz3, 0.0)
            # pow(defr, rexp), defr >= 0, rexp > 0 (exp/log on the EUP)
            defr_pow = jnp.where(defr > 0.0,
                                 jnp.exp(rexp * jnp.log(jnp.maximum(defr, 1e-38))),
                                 0.0)
            perc = pbase * (1.0 + zperc * defr_pow) * (uf * r_uzfwm)
            rate = jnp.maximum(jnp.minimum(perc, sum_lz3 - (lzfs + lzfp + lt1)), 0.0)
            fx = jnp.maximum(
                jnp.minimum(sum_fsp - (lzfs + lzfp),
                            jnp.maximum(rate - (lztwm - lt1), rate * pfree)), 0.0)
            perct = jnp.maximum(rate - fx, 0.0)
            percp = jnp.maximum(
                jnp.minimum(lzfpm - lzfp,
                            jnp.maximum(fx - (lzfsm - lzfs), coef * fx)), 0.0)
            percs = jnp.maximum(fx - percp, 0.0)

            # ----- lower-zone updates -----
            lt2 = lt1 + perct
            ls = lzfs + percs
            lp = lzfp + percp
            rgs = ls * lzsk
            ls2 = jnp.maximum(ls - rgs, 0.0)
            rgp = lp * lzpk
            lp2 = jnp.maximum(lp - rgp, 0.0)

            utr = ut * r_uztwm
            ufr = uf * r_uzfwm
            utfr = (ut + uf) * r_sum_uz
            uz_c = utr < ufr
            uztw_n = jnp.where(uz_c, uztwm * utfr, ut)
            uzfw_n = jnp.where(uz_c, uzfwm * utfr, uf)

            ratio = jnp.maximum((ls + lp - saved + lt2) * r_ratio, 0.0)
            ltr = lt2 * r_lztwm
            lz_c = ltr < ratio
            lztw_n = jnp.where(lz_c, lztwm * ratio, lt2)
            lzfs_n = jnp.where(lz_c, jnp.maximum(ls - (lztw_n - lt2), 0.0), ls2)
            lzfp_n = jnp.where(lz_c, lp - jnp.maximum(lztw_n - lt2 - ls, 0.0), lp2)

            # ----- routing (second torch loop, fused) -----
            i1 = qs + qi + qgs + qgp                              # q_sim_0
            # torch stores adsur*adimp / ars*adimp then multiplies by adimp
            # again -> (adsur+ars)*adimp^2, reproduced verbatim via adimp2.
            qs_n = (roimp + (adsur + ars) * adimp2 + rs * parea2) * 1000.0
            qi_n = jnp.maximum(ci * qi + ri * ci_u, 0.0)
            qgs_n = jnp.maximum(cgs * qgs + rgs * cgs_u, 0.0)
            qgp_n = jnp.maximum(cgp * qgp + rgp * cgp_u, 0.0)
            i2 = qs_n + qi_n + qgs_n + qgp_n
            i2_ = c1_ * i1 + c2 * i2 + c3 * mq                    # Muskingum step
            mq_n = i2_

            esim_ref[pl.ds(i, 1)] = et[None]
            qsim_ref[pl.ds(i, 1)] = i2_[None]

            new = (auztw_n, alztw_n, uztw_n, uzfw_n, lztw_n, lzfs_n, lzfp_n,
                   qs_n, qi_n, qgs_n, qgp_n, mq_n)
            if mask_tail:
                # Freeze the state on padded tail steps so the returned final
                # state matches the un-padded recurrence exactly.
                valid = (base + i) < t_total
                maskv = jnp.full(new[0].shape, valid)
                new = tuple(jnp.where(maskv, n, o) for n, o in zip(new, carry))
            return new

        init = tuple(state_scr[k] for k in range(12))

        def outer(j, carry):
            i0 = j * _UNROLL
            for uu in range(_UNROLL):
                carry = step(i0 + uu, carry)
            return carry

        final = lax.fori_loop(0, tile_t // _UNROLL, outer, init)

        for k in range(12):
            v = final[k][None]
            state_scr[k:k + 1] = v
            state_out_ref[k:k + 1] = v

    return kernel


def _run_sac_kernel(prcp, pet, scaled_params, state0, *, tile_t, t_total):
    """prcp/pet: (T_pad, S_pad, 128); scaled_params: (21, S_pad, 128);
    state0: (12, S_pad, 128)."""
    t_pad, s_pad, _ = prcp.shape
    n_bblk = s_pad // _SUBL
    n_tblk = t_pad // tile_t

    kernel = _make_sac_kernel(tile_t, t_total)

    io_map = lambda b, t: (t, b, 0)
    par_map = lambda b, t: (0, b, 0)

    out_shape = (
        jax.ShapeDtypeStruct((t_pad, s_pad, _LANE), jnp.float32),   # q_sim
        jax.ShapeDtypeStruct((t_pad, s_pad, _LANE), jnp.float32),   # e_sim
        jax.ShapeDtypeStruct((12, s_pad, _LANE), jnp.float32),      # final state
    )

    grid_spec = pltpu.PrefetchScalarGridSpec(
        num_scalar_prefetch=0,
        grid=(n_bblk, n_tblk),
        in_specs=[
            pl.BlockSpec((tile_t, _SUBL, _LANE), io_map),   # prcp
            pl.BlockSpec((tile_t, _SUBL, _LANE), io_map),   # pet
            pl.BlockSpec((21, _SUBL, _LANE), par_map),      # params
            pl.BlockSpec((12, _SUBL, _LANE), par_map),      # state0
        ],
        out_specs=(
            pl.BlockSpec((tile_t, _SUBL, _LANE), io_map),   # q_sim
            pl.BlockSpec((tile_t, _SUBL, _LANE), io_map),   # e_sim
            pl.BlockSpec((12, _SUBL, _LANE), par_map),      # final state (resident)
        ),
        scratch_shapes=[pltpu.VMEM((12, _SUBL, _LANE), jnp.float32)],
    )

    # 2 buffers x (4 streamed blocks + params/state blocks) + slack for scratch/spills.
    vmem_limit = 2 * (4 * tile_t + 45) * _TILE_B * 4 + (8 << 20)

    return pl.pallas_call(
        kernel,
        out_shape=out_shape,
        grid_spec=grid_spec,
        compiler_params=pltpu.CompilerParams(
            dimension_semantics=("parallel", "arbitrary"),
            vmem_limit_bytes=int(vmem_limit),
        ),
    )(prcp, pet, scaled_params, state0)


@functools.partial(jax.jit, static_argnames=("warmup_length", "return_state"))
def sac4dpl_forward(p_and_e, parameters, warmup_length=0, return_state=False):
    """JAX/Pallas equivalent of Sac4Dpl.forward.

    p_and_e    : (time, basin, 2) float32 -- [:, :, 0] precip, [:, :, 1] PET
    parameters : (basin, 21) float32 in [0, 1]
    returns (q_sim (T', B, 1), e_sim (T', B, 1)) with T' = time - warmup_length
    """
    p_and_e = jnp.asarray(p_and_e, jnp.float32)
    parameters = jnp.asarray(parameters, jnp.float32)
    n_time, n_basin, _ = p_and_e.shape

    # ---- basin padding / packing into (S_pad, 128) slabs ----
    b_pad = _round_up(max(n_basin, 1), _TILE_B)
    pad_b = b_pad - n_basin
    s_pad = b_pad // _LANE

    lo = jnp.array([SAC_PARAM_RANGE[n][0] for n in SAC_PARAM_NAMES], jnp.float32)
    hi = jnp.array([SAC_PARAM_RANGE[n][1] for n in SAC_PARAM_NAMES], jnp.float32)
    params_pad = jnp.pad(parameters, ((0, pad_b), (0, 0)), constant_values=0.5)
    scaled = lo[None, :] + params_pad * (hi - lo)[None, :]            # (B_pad, 21)
    scaled = scaled.T.reshape(21, s_pad, _LANE)

    # ---- time padding / tiling ----
    tile_t = min(_MAX_TILE_T, _round_up(n_time, 8))
    t_pad = _round_up(n_time, tile_t)

    prcp = jnp.pad(p_and_e[:, :, 0], ((0, t_pad - n_time), (0, pad_b)))
    pet = jnp.pad(p_and_e[:, :, 1], ((0, t_pad - n_time), (0, pad_b)))
    prcp = prcp.reshape(t_pad, s_pad, _LANE)
    pet = pet.reshape(t_pad, s_pad, _LANE)

    # initial state: auztw..qgp = 0.01, mq = 0.01 (warmup_length == 0 branch);
    # the warmup pass is fused into the same kernel run (identical forward values).
    state0 = jnp.full((12, s_pad, _LANE), 0.01, jnp.float32)

    q, e, state = _run_sac_kernel(prcp, pet, scaled, state0,
                                  tile_t=tile_t, t_total=n_time)

    q = q.reshape(t_pad, b_pad)[:n_time, :n_basin]
    e = e.reshape(t_pad, b_pad)[:n_time, :n_basin]
    state = state.reshape(12, b_pad)[:, :n_basin]

    q_sim = q[warmup_length:, :, None]
    e_sim = e[warmup_length:, :, None]
    if return_state:
        states = tuple(state[k] for k in range(11)) + (state[11][:, None],)  # mq (B,1)
        return (q_sim, e_sim) + states
    return q_sim, e_sim


if __name__ == "__main__":
    key = jax.random.PRNGKey(0)
    k1, k2, k3 = jax.random.split(key, 3)

    n_time, n_basin, warmup = 10, 8, 2
    prcp = jax.random.uniform(k1, (n_time, n_basin), jnp.float32, 0.0, 20.0)
    pet = jax.random.uniform(k2, (n_time, n_basin), jnp.float32, 0.0, 5.0)
    p_and_e = jnp.stack([prcp, pet], axis=-1)                 # (time, basin, 2)
    parameters = jax.random.uniform(k3, (n_basin, 21), jnp.float32)

    q_sim, e_sim = sac4dpl_forward(p_and_e, parameters, warmup_length=warmup)
    q_sim = jax.block_until_ready(q_sim)
    e_sim = jax.block_until_ready(e_sim)

    assert q_sim.shape == (n_time - warmup, n_basin, 1)
    assert e_sim.shape == (n_time - warmup, n_basin, 1)
    assert bool(jnp.all(jnp.isfinite(q_sim))) and bool(jnp.all(jnp.isfinite(e_sim)))
    print("KERNEL_OK")
</pallas_src>

<mosaic_0001>
module attributes {stable_mosaic.version = 11 : i64} {
  func.func @kernel(%arg0: i32, %arg1: i32, %arg2: memref<16x8x128xf32, #tpu.memory_space<vmem>>, %arg3: memref<16x8x128xf32, #tpu.memory_space<vmem>>, %arg4: memref<21x8x128xf32, #tpu.memory_space<vmem>>, %arg5: memref<12x8x128xf32, #tpu.memory_space<vmem>>, %arg6: memref<16x8x128xf32, #tpu.memory_space<vmem>>, %arg7: memref<16x8x128xf32, #tpu.memory_space<vmem>>, %arg8: memref<12x8x128xf32, #tpu.memory_space<vmem>>, %arg9: memref<12x8x128xf32, #tpu.memory_space<vmem>>) attributes {dimension_semantics = [#tpu.dimension_semantics<parallel>, #tpu.dimension_semantics<arbitrary>], iteration_bounds = array<i64: 1, 1>, scalar_prefetch = 0 : i64, scratch_operands = 1 : i64, tpu.core_type = #tpu.core_type<tc>, window_params = [{transform_indices = @transform_0, window_bounds = array<i64: 16, 8, 128>}, {transform_indices = @transform_1, window_bounds = array<i64: 16, 8, 128>}, {transform_indices = @transform_2, window_bounds = array<i64: 21, 8, 128>}, {transform_indices = @transform_3, window_bounds = array<i64: 12, 8, 128>}, {transform_indices = @transform_4, window_bounds = array<i64: 16, 8, 128>}, {transform_indices = @transform_5, window_bounds = array<i64: 16, 8, 128>}, {transform_indices = @transform_6, window_bounds = array<i64: 12, 8, 128>}]} {
    %c0_i32 = arith.constant 0 : i32
    %0 = arith.cmpi eq, %arg1, %c0_i32 : i32
    %1 = arith.extui %0 : i1 to i32
    %c0_i32_0 = arith.constant 0 : i32
    %2 = arith.cmpi ne, %1, %c0_i32_0 : i32
    scf.if %2 {
      %c0_179 = arith.constant 0 : index
      %c0_180 = arith.constant 0 : index
      %c0_181 = arith.constant 0 : index
      %185 = vector.load %arg5[%c0_179, %c0_180, %c0_181] : memref<12x8x128xf32, #tpu.memory_space<vmem>>, vector<12x8x128xf32>
      %c0_182 = arith.constant 0 : index
      %c0_183 = arith.constant 0 : index
      %c0_184 = arith.constant 0 : index
      %186 = vector.load %arg9[%c0_182, %c0_183, %c0_184] : memref<12x8x128xf32, #tpu.memory_space<vmem>>, vector<12x8x128xf32>
      tpu.vector_store %arg9[%c0_182, %c0_183, %c0_184], %185 {strides = array<i32>} : memref<12x8x128xf32, #tpu.memory_space<vmem>>, vector<12x8x128xf32>,
    } else {
    }
    %c0 = arith.constant 0 : index
    %c0_1 = arith.constant 0 : index
    %c0_2 = arith.constant 0 : index
    %3 = vector.load %arg4[%c0, %c0_1, %c0_2] : memref<21x8x128xf32, #tpu.memory_space<vmem>>, vector<1x8x128xf32>
    %4 = vector.shape_cast %3 : vector<1x8x128xf32> to vector<8x128xf32>
    %c1 = arith.constant 1 : index
    %c0_3 = arith.constant 0 : index
    %c0_4 = arith.constant 0 : index
    %5 = vector.load %arg4[%c1, %c0_3, %c0_4] : memref<21x8x128xf32, #tpu.memory_space<vmem>>, vector<1x8x128xf32>
    %6 = vector.shape_cast %5 : vector<1x8x128xf32> to vector<8x128xf32>
    %c2 = arith.constant 2 : index
    %c0_5 = arith.constant 0 : index
    %c0_6 = arith.constant 0 : index
    %7 = vector.load %arg4[%c2, %c0_5, %c0_6] : memref<21x8x128xf32, #tpu.memory_space<vmem>>, vector<1x8x128xf32>
    %8 = vector.shape_cast %7 : vector<1x8x128xf32> to vector<8x128xf32>
    %c3 = arith.constant 3 : index
    %c0_7 = arith.constant 0 : index
    %c0_8 = arith.constant 0 : index
    %9 = vector.load %arg4[%c3, %c0_7, %c0_8] : memref<21x8x128xf32, #tpu.memory_space<vmem>>, vector<1x8x128xf32>
    %10 = vector.shape_cast %9 : vector<1x8x128xf32> to vector<8x128xf32>
    %c4 = arith.constant 4 : index
    %c0_9 = arith.constant 0 : index
    %c0_10 = arith.constant 0 : index
    %11 = vector.load %arg4[%c4, %c0_9, %c0_10] : memref<21x8x128xf32, #tpu.memory_space<vmem>>, vector<1x8x128xf32>
    %12 = vector.shape_cast %11 : vector<1x8x128xf32> to vector<8x128xf32>
    %c5 = arith.constant 5 : index
    %c0_11 = arith.constant 0 : index
    %c0_12 = arith.constant 0 : index
    %13 = vector.load %arg4[%c5, %c0_11, %c0_12] : memref<21x8x128xf32, #tpu.memory_space<vmem>>, vector<1x8x128xf32>
    %14 = vector.shape_cast %13 : vector<1x8x128xf32> to vector<8x128xf32>
    %c6 = arith.constant 6 : index
    %c0_13 = arith.constant 0 : index
    %c0_14 = arith.constant 0 : index
    %15 = vector.load %arg4[%c6, %c0_13, %c0_14] : memref<21x8x128xf32, #tpu.memory_space<vmem>>, vector<1x8x128xf32>
    %16 = vector.shape_cast %15 : vector<1x8x128xf32> to vector<8x128xf32>
    %c7 = arith.constant 7 : index
    %c0_15 = arith.constant 0 : index
    %c0_16 = arith.constant 0 : index
    %17 = vector.load %arg4[%c7, %c0_15, %c0_16] : memref<21x8x128xf32, #tpu.memory_space<vmem>>, vector<1x8x128xf32>
    %18 = vector.shape_cast %17 : vector<1x8x128xf32> to vector<8x128xf32>
    %c8 = arith.constant 8 : index
    %c0_17 = arith.constant 0 : index
    %c0_18 = arith.constant 0 : index
    %19 = vector.load %arg4[%c8, %c0_17, %c0_18] : memref<21x8x128xf32, #tpu.memory_space<vmem>>, vector<1x8x128xf32>
    %20 = vector.shape_cast %19 : vector<1x8x128xf32> to vector<8x128xf32>
    %c9 = arith.constant 9 : index
    %c0_19 = arith.constant 0 : index
    %c0_20 = arith.constant 0 : index
    %21 = vector.load %arg4[%c9, %c0_19, %c0_20] : memref<21x8x128xf32, #tpu.memory_space<vmem>>, vector<1x8x128xf32>
    %22 = vector.shape_cast %21 : vector<1x8x128xf32> to vector<8x128xf32>
    %c10 = arith.constant 10 : index
    %c0_21 = arith.constant 0 : index
    %c0_22 = arith.constant 0 : index
    %23 = vector.load %arg4[%c10, %c0_21, %c0_22] : memref<21x8x128xf32, #tpu.memory_space<vmem>>, vector<1x8x128xf32>
    %24 = vector.shape_cast %23 : vector<1x8x128xf32> to vector<8x128xf32>
    %c11 = arith.constant 11 : index
    %c0_23 = arith.constant 0 : index
    %c0_24 = arith.constant 0 : index
    %25 = vector.load %arg4[%c11, %c0_23, %c0_24] : memref<21x8x128xf32, #tpu.memory_space<vmem>>, vector<1x8x128xf32>
    %26 = vector.shape_cast %25 : vector<1x8x128xf32> to vector<8x128xf32>
    %c12 = arith.constant 12 : index
    %c0_25 = arith.constant 0 : index
    %c0_26 = arith.constant 0 : index
    %27 = vector.load %arg4[%c12, %c0_25, %c0_26] : memref<21x8x128xf32, #tpu.memory_space<vmem>>, vector<1x8x128xf32>
    %28 = vector.shape_cast %27 : vector<1x8x128xf32> to vector<8x128xf32>
    %c13 = arith.constant 13 : index
    %c0_27 = arith.constant 0 : index
    %c0_28 = arith.constant 0 : index
    %29 = vector.load %arg4[%c13, %c0_27, %c0_28] : memref<21x8x128xf32, #tpu.memory_space<vmem>>, vector<1x8x128xf32>
    %30 = vector.shape_cast %29 : vector<1x8x128xf32> to vector<8x128xf32>
    %c14 = arith.constant 14 : index
    %c0_29 = arith.constant 0 : index
    %c0_30 = arith.constant 0 : index
    %31 = vector.load %arg4[%c14, %c0_29, %c0_30] : memref<21x8x128xf32, #tpu.memory_space<vmem>>, vector<1x8x128xf32>
    %32 = vector.shape_cast %31 : vector<1x8x128xf32> to vector<8x128xf32>
    %c15 = arith.constant 15 : index
    %c0_31 = arith.constant 0 : index
    %c0_32 = arith.constant 0 : index
    %33 = vector.load %arg4[%c15, %c0_31, %c0_32] : memref<21x8x128xf32, #tpu.memory_space<vmem>>, vector<1x8x128xf32>
    %34 = vector.shape_cast %33 : vector<1x8x128xf32> to vector<8x128xf32>
    %c16 = arith.constant 16 : index
    %c0_33 = arith.constant 0 : index
    %c0_34 = arith.constant 0 : index
    %35 = vector.load %arg4[%c16, %c0_33, %c0_34] : memref<21x8x128xf32, #tpu.memory_space<vmem>>, vector<1x8x128xf32>
    %36 = vector.shape_cast %35 : vector<1x8x128xf32> to vector<8x128xf32>
    %c17 = arith.constant 17 : index
    %c0_35 = arith.constant 0 : index
    %c0_36 = arith.constant 0 : index
    %37 = vector.load %arg4[%c17, %c0_35, %c0_36] : memref<21x8x128xf32, #tpu.memory_space<vmem>>, vector<1x8x128xf32>
    %38 = vector.shape_cast %37 : vector<1x8x128xf32> to vector<8x128xf32>
    %c18 = arith.constant 18 : index
    %c0_37 = arith.constant 0 : index
    %c0_38 = arith.constant 0 : index
    %39 = vector.load %arg4[%c18, %c0_37, %c0_38] : memref<21x8x128xf32, #tpu.memory_space<vmem>>, vector<1x8x128xf32>
    %40 = vector.shape_cast %39 : vector<1x8x128xf32> to vector<8x128xf32>
    %c19 = arith.constant 19 : index
    %c0_39 = arith.constant 0 : index
    %c0_40 = arith.constant 0 : index
    %41 = vector.load %arg4[%c19, %c0_39, %c0_40] : memref<21x8x128xf32, #tpu.memory_space<vmem>>, vector<1x8x128xf32>
    %42 = vector.shape_cast %41 : vector<1x8x128xf32> to vector<8x128xf32>
    %c20 = arith.constant 20 : index
    %c0_41 = arith.constant 0 : index
    %c0_42 = arith.constant 0 : index
    %43 = vector.load %arg4[%c20, %c0_41, %c0_42] : memref<21x8x128xf32, #tpu.memory_space<vmem>>, vector<1x8x128xf32>
    %44 = vector.shape_cast %43 : vector<1x8x128xf32> to vector<8x128xf32>
    %cst = arith.constant 1.000000e+00 : f32
    %45 = vector.broadcast %cst : f32 to vector<8x128xf32>
    %46 = arith.divf %45, %10 : vector<8x128xf32>
    %cst_43 = arith.constant 1.000000e+00 : f32
    %47 = vector.broadcast %cst_43 : f32 to vector<8x128xf32>
    %48 = arith.divf %47, %14 : vector<8x128xf32>
    %cst_44 = arith.constant 1.000000e+00 : f32
    %49 = vector.broadcast %cst_44 : f32 to vector<8x128xf32>
    %50 = arith.divf %49, %12 : vector<8x128xf32>
    %51 = arith.addf %10, %12 : vector<8x128xf32>
    %cst_45 = arith.constant 1.000000e+00 : f32
    %52 = vector.broadcast %cst_45 : f32 to vector<8x128xf32>
    %53 = arith.divf %52, %51 : vector<8x128xf32>
    %54 = arith.addf %10, %14 : vector<8x128xf32>
    %cst_46 = arith.constant 1.000000e+00 : f32
    %55 = vector.broadcast %cst_46 : f32 to vector<8x128xf32>
    %56 = arith.divf %55, %54 : vector<8x128xf32>
    %57 = arith.addf %16, %18 : vector<8x128xf32>
    %58 = arith.addf %57, %14 : vector<8x128xf32>
    %cst_47 = arith.constant 1.000000e+00 : f32
    %59 = vector.broadcast %cst_47 : f32 to vector<8x128xf32>
    %60 = arith.divf %59, %58 : vector<8x128xf32>
    %61 = arith.mulf %16, %32 : vector<8x128xf32>
    %62 = arith.mulf %18, %34 : vector<8x128xf32>
    %63 = arith.addf %61, %62 : vector<8x128xf32>
    %64 = arith.mulf %20, %57 : vector<8x128xf32>
    %65 = arith.subf %57, %64 : vector<8x128xf32>
    %66 = arith.addf %65, %14 : vector<8x128xf32>
    %cst_48 = arith.constant 1.000000e+00 : f32
    %67 = vector.broadcast %cst_48 : f32 to vector<8x128xf32>
    %68 = arith.divf %67, %66 : vector<8x128xf32>
    %cst_49 = arith.constant 2.000000e+00 : f32
    %69 = vector.broadcast %cst_49 : f32 to vector<8x128xf32>
    %70 = arith.mulf %69, %18 : vector<8x128xf32>
    %71 = arith.divf %70, %57 : vector<8x128xf32>
    %cst_50 = arith.constant 0.000000e+00 : f32
    %cst_51 = arith.constant 1.000000e+00 : f32
    %72 = vector.broadcast %cst_50 : f32 to vector<8x128xf32>
    %73 = arith.maximumf %72, %71 : vector<8x128xf32>
    %74 = vector.broadcast %cst_51 : f32 to vector<8x128xf32>
    %75 = arith.minimumf %74, %73 : vector<8x128xf32>
    %cst_52 = arith.constant 1.000000e+00 : f32
    %76 = vector.broadcast %cst_52 : f32 to vector<8x128xf32>
    %77 = arith.subf %76, %6 : vector<8x128xf32>
    %78 = arith.subf %77, %8 : vector<8x128xf32>
    %cst_53 = arith.constant 0.000000e+00 : f32
    %79 = vector.broadcast %cst_53 : f32 to vector<8x128xf32>
    %80 = arith.maximumf %78, %79 : vector<8x128xf32>
    %cst_54 = arith.constant 1.000000e+03 : f32
    %81 = vector.broadcast %cst_54 : f32 to vector<8x128xf32>
    %82 = arith.mulf %78, %81 : vector<8x128xf32>
    %83 = arith.mulf %8, %8 : vector<8x128xf32>
    %cst_55 = arith.constant 1.000000e+00 : f32
    %84 = vector.broadcast %cst_55 : f32 to vector<8x128xf32>
    %85 = arith.subf %84, %36 : vector<8x128xf32>
    %86 = arith.mulf %85, %82 : vector<8x128xf32>
    %cst_56 = arith.constant 1.000000e+00 : f32
    %87 = vector.broadcast %cst_56 : f32 to vector<8x128xf32>
    %88 = arith.subf %87, %38 : vector<8x128xf32>
    %89 = arith.mulf %88, %82 : vector<8x128xf32>
    %cst_57 = arith.constant 1.000000e+00 : f32
    %90 = vector.broadcast %cst_57 : f32 to vector<8x128xf32>
    %91 = arith.subf %90, %40 : vector<8x128xf32>
    %92 = arith.mulf %91, %82 : vector<8x128xf32>
    %cst_58 = arith.constant 2.400000e+01 : f32
    %93 = vector.broadcast %cst_58 : f32 to vector<8x128xf32>
    %94 = arith.mulf %42, %93 : vector<8x128xf32>
    %cst_59 = arith.constant 1.000000e+00 : f32
    %95 = vector.broadcast %cst_59 : f32 to vector<8x128xf32>
    %96 = arith.subf %95, %44 : vector<8x128xf32>
    %97 = arith.mulf %94, %96 : vector<8x128xf32>
    %cst_60 = arith.constant 1.200000e+01 : f32
    %98 = vector.broadcast %cst_60 : f32 to vector<8x128xf32>
    %99 = arith.addf %97, %98 : vector<8x128xf32>
    %cst_61 = arith.constant 0.000000e+00 : f32
    %100 = vector.broadcast %cst_61 : f32 to vector<8x128xf32>
    %101 = arith.maximumf %99, %100 : vector<8x128xf32>
    %cst_62 = arith.constant 0.000000e+00 : f32
    %102 = vector.broadcast %cst_62 : f32 to vector<8x128xf32>
    %103 = arith.subf %102, %94 : vector<8x128xf32>
    %104 = arith.mulf %103, %44 : vector<8x128xf32>
    %cst_63 = arith.constant 1.200000e+01 : f32
    %105 = vector.broadcast %cst_63 : f32 to vector<8x128xf32>
    %106 = arith.addf %104, %105 : vector<8x128xf32>
    %107 = arith.divf %106, %101 : vector<8x128xf32>
    %cst_64 = arith.constant 0.000000e+00 : f32
    %108 = vector.broadcast %cst_64 : f32 to vector<8x128xf32>
    %109 = arith.maximumf %107, %108 : vector<8x128xf32>
    %cst_65 = arith.constant 1.000000e+00 : f32
    %110 = vector.broadcast %cst_65 : f32 to vector<8x128xf32>
    %111 = arith.subf %110, %44 : vector<8x128xf32>
    %112 = arith.mulf %94, %111 : vector<8x128xf32>
    %cst_66 = arith.constant 1.200000e+01 : f32
    %113 = vector.broadcast %cst_66 : f32 to vector<8x128xf32>
    %114 = arith.subf %112, %113 : vector<8x128xf32>
    %115 = arith.divf %114, %101 : vector<8x128xf32>
    %cst_67 = arith.constant 0.000000e+00 : f32
    %116 = vector.broadcast %cst_67 : f32 to vector<8x128xf32>
    %117 = arith.maximumf %115, %116 : vector<8x128xf32>
    %118 = arith.mulf %94, %44 : vector<8x128xf32>
    %cst_68 = arith.constant 1.200000e+01 : f32
    %119 = vector.broadcast %cst_68 : f32 to vector<8x128xf32>
    %120 = arith.addf %118, %119 : vector<8x128xf32>
    %121 = arith.divf %120, %101 : vector<8x128xf32>
    %c16_i32 = arith.constant 16 : i32
    %122 = arith.muli %arg1, %c16_i32 : i32
    %c0_69 = arith.constant 0 : index
    %c0_70 = arith.constant 0 : index
    %c0_71 = arith.constant 0 : index
    %123 = vector.load %arg9[%c0_69, %c0_70, %c0_71] : memref<12x8x128xf32, #tpu.memory_space<vmem>>, vector<1x8x128xf32>
    %124 = vector.shape_cast %123 : vector<1x8x128xf32> to vector<8x128xf32>
    %c1_72 = arith.constant 1 : index
    %c0_73 = arith.constant 0 : index
    %c0_74 = arith.constant 0 : index
    %125 = vector.load %arg9[%c1_72, %c0_73, %c0_74] : memref<12x8x128xf32, #tpu.memory_space<vmem>>, vector<1x8x128xf32>
    %126 = vector.shape_cast %125 : vector<1x8x128xf32> to vector<8x128xf32>
    %c2_75 = arith.constant 2 : index
    %c0_76 = arith.constant 0 : index
    %c0_77 = arith.constant 0 : index
    %127 = vector.load %arg9[%c2_75, %c0_76, %c0_77] : memref<12x8x128xf32, #tpu.memory_space<vmem>>, vector<1x8x128xf32>
    %128 = vector.shape_cast %127 : vector<1x8x128xf32> to vector<8x128xf32>
    %c3_78 = arith.constant 3 : index
    %c0_79 = arith.constant 0 : index
    %c0_80 = arith.constant 0 : index
    %129 = vector.load %arg9[%c3_78, %c0_79, %c0_80] : memref<12x8x128xf32, #tpu.memory_space<vmem>>, vector<1x8x128xf32>
    %130 = vector.shape_cast %129 : vector<1x8x128xf32> to vector<8x128xf32>
    %c4_81 = arith.constant 4 : index
    %c0_82 = arith.constant 0 : index
    %c0_83 = arith.constant 0 : index
    %131 = vector.load %arg9[%c4_81, %c0_82, %c0_83] : memref<12x8x128xf32, #tpu.memory_space<vmem>>, vector<1x8x128xf32>
    %132 = vector.shape_cast %131 : vector<1x8x128xf32> to vector<8x128xf32>
    %c5_84 = arith.constant 5 : index
    %c0_85 = arith.constant 0 : index
    %c0_86 = arith.constant 0 : index
    %133 = vector.load %arg9[%c5_84, %c0_85, %c0_86] : memref<12x8x128xf32, #tpu.memory_space<vmem>>, vector<1x8x128xf32>
    %134 = vector.shape_cast %133 : vector<1x8x128xf32> to vector<8x128xf32>
    %c6_87 = arith.constant 6 : index
    %c0_88 = arith.constant 0 : index
    %c0_89 = arith.constant 0 : index
    %135 = vector.load %arg9[%c6_87, %c0_88, %c0_89] : memref<12x8x128xf32, #tpu.memory_space<vmem>>, vector<1x8x128xf32>
    %136 = vector.shape_cast %135 : vector<1x8x128xf32> to vector<8x128xf32>
    %c7_90 = arith.constant 7 : index
    %c0_91 = arith.constant 0 : index
    %c0_92 = arith.constant 0 : index
    %137 = vector.load %arg9[%c7_90, %c0_91, %c0_92] : memref<12x8x128xf32, #tpu.memory_space<vmem>>, vector<1x8x128xf32>
    %138 = vector.shape_cast %137 : vector<1x8x128xf32> to vector<8x128xf32>
    %c8_93 = arith.constant 8 : index
    %c0_94 = arith.constant 0 : index
    %c0_95 = arith.constant 0 : index
    %139 = vector.load %arg9[%c8_93, %c0_94, %c0_95] : memref<12x8x128xf32, #tpu.memory_space<vmem>>, vector<1x8x128xf32>
    %140 = vector.shape_cast %139 : vector<1x8x128xf32> to vector<8x128xf32>
    %c9_96 = arith.constant 9 : index
    %c0_97 = arith.constant 0 : index
    %c0_98 = arith.constant 0 : index
    %141 = vector.load %arg9[%c9_96, %c0_97, %c0_98] : memref<12x8x128xf32, #tpu.memory_space<vmem>>, vector<1x8x128xf32>
    %142 = vector.shape_cast %141 : vector<1x8x128xf32> to vector<8x128xf32>
    %c10_99 = arith.constant 10 : index
    %c0_100 = arith.constant 0 : index
    %c0_101 = arith.constant 0 : index
    %143 = vector.load %arg9[%c10_99, %c0_100, %c0_101] : memref<12x8x128xf32, #tpu.memory_space<vmem>>, vector<1x8x128xf32>
    %144 = vector.shape_cast %143 : vector<1x8x128xf32> to vector<8x128xf32>
    %c11_102 = arith.constant 11 : index
    %c0_103 = arith.constant 0 : index
    %c0_104 = arith.constant 0 : index
    %145 = vector.load %arg9[%c11_102, %c0_103, %c0_104] : memref<12x8x128xf32, #tpu.memory_space<vmem>>, vector<1x8x128xf32>
    %146 = vector.shape_cast %145 : vector<1x8x128xf32> to vector<8x128xf32>
    %c0_i32_105 = arith.constant 0 : i32
    %c8_i32 = arith.constant 8 : i32
    %147 = arith.addi %c0_i32_105, %c8_i32 : i32
    %c1_i32 = arith.constant 1 : i32
    %148:12 = scf.for %arg10 = %c0_i32_105 to %147 step %c1_i32 iter_args(%arg11 = %124, %arg12 = %126, %arg13 = %128, %arg14 = %130, %arg15 = %132, %arg16 = %134, %arg17 = %136, %arg18 = %138, %arg19 = %140, %arg20 = %142, %arg21 = %144, %arg22 = %146) -> (vector<8x128xf32>, vector<8x128xf32>, vector<8x128xf32>, vector<8x128xf32>, vector<8x128xf32>, vector<8x128xf32>, vector<8x128xf32>, vector<8x128xf32>, vector<8x128xf32>, vector<8x128xf32>, vector<8x128xf32>, vector<8x128xf32>)  : i32 {
      %c2_i32 = arith.constant 2 : i32
      %185 = arith.muli %arg10, %c2_i32 : i32
      %c0_i32_179 = arith.constant 0 : i32
      %186 = arith.addi %185, %c0_i32_179 : i32
      %187 = arith.index_cast %186 : i32 to index
      %c0_180 = arith.constant 0 : index
      %c0_181 = arith.constant 0 : index
      %188 = vector.load %arg2[%187, %c0_180, %c0_181] : memref<16x8x128xf32, #tpu.memory_space<vmem>>, vector<1x8x128xf32>
      %189 = vector.shape_cast %188 : vector<1x8x128xf32> to vector<8x128xf32>
      %cst_182 = arith.constant 0.000000e+00 : f32
      %190 = vector.broadcast %cst_182 : f32 to vector<8x128xf32>
      %191 = arith.maximumf %189, %190 : vector<8x128xf32>
      %192 = arith.index_cast %186 : i32 to index
      %c0_183 = arith.constant 0 : index
      %c0_184 = arith.constant 0 : index
      %193 = vector.load %arg3[%192, %c0_183, %c0_184] : memref<16x8x128xf32, #tpu.memory_space<vmem>>, vector<1x8x128xf32>
      %194 = vector.shape_cast %193 : vector<1x8x128xf32> to vector<8x128xf32>
      %195 = arith.cmpf one, %194, %194 : vector<8x128xf32>
      %196 = math.absf %194 : vector<8x128xf32>
      %cst_185 = arith.constant 0x7F800000 : f32
      %197 = vector.broadcast %cst_185 : f32 to vector<8x128xf32>
      %198 = arith.cmpf oeq, %196, %197 : vector<8x128xf32>
      %199 = arith.ori %195, %198 : vector<8x128xi1>
      %cst_186 = arith.constant 0.000000e+00 : f32
      %200 = vector.broadcast %cst_186 : f32 to vector<8x128xf32>
      %201 = arith.select %199, %200, %194 : vector<8x128xi1>, vector<8x128xf32>
      %cst_187 = arith.constant 0.000000e+00 : f32
      %202 = vector.broadcast %cst_187 : f32 to vector<8x128xf32>
      %203 = arith.maximumf %201, %202 : vector<8x128xf32>
      %204 = arith.mulf %4, %203 : vector<8x128xf32>
      %205 = arith.mulf %6, %191 : vector<8x128xf32>
      %206 = arith.mulf %6, %204 : vector<8x128xf32>
      %207 = arith.mulf %arg11, %46 : vector<8x128xf32>
      %208 = arith.mulf %204, %207 : vector<8x128xf32>
      %209 = arith.minimumf %arg11, %208 : vector<8x128xf32>
      %210 = arith.subf %204, %209 : vector<8x128xf32>
      %211 = arith.mulf %arg12, %56 : vector<8x128xf32>
      %212 = arith.mulf %210, %211 : vector<8x128xf32>
      %cst_188 = arith.constant 0.000000e+00 : f32
      %213 = vector.broadcast %cst_188 : f32 to vector<8x128xf32>
      %214 = arith.maximumf %212, %213 : vector<8x128xf32>
      %215 = arith.subf %arg11, %209 : vector<8x128xf32>
      %216 = arith.subf %10, %215 : vector<8x128xf32>
      %217 = arith.subf %191, %216 : vector<8x128xf32>
      %cst_189 = arith.constant 0.000000e+00 : f32
      %218 = vector.broadcast %cst_189 : f32 to vector<8x128xf32>
      %219 = arith.maximumf %217, %218 : vector<8x128xf32>
      %220 = arith.subf %arg12, %214 : vector<8x128xf32>
      %221 = arith.mulf %220, %48 : vector<8x128xf32>
      %222 = arith.mulf %219, %221 : vector<8x128xf32>
      %cst_190 = arith.constant 0.000000e+00 : f32
      %223 = vector.broadcast %cst_190 : f32 to vector<8x128xf32>
      %224 = arith.maximumf %222, %223 : vector<8x128xf32>
      %225 = arith.subf %219, %224 : vector<8x128xf32>
      %226 = arith.subf %arg12, %214 : vector<8x128xf32>
      %227 = arith.addf %225, %226 : vector<8x128xf32>
      %228 = arith.subf %227, %14 : vector<8x128xf32>
      %cst_191 = arith.constant 0.000000e+00 : f32
      %229 = vector.broadcast %cst_191 : f32 to vector<8x128xf32>
      %230 = arith.maximumf %228, %229 : vector<8x128xf32>
      %231 = arith.subf %arg11, %209 : vector<8x128xf32>
      %232 = arith.addf %231, %191 : vector<8x128xf32>
      %233 = arith.minimumf %10, %232 : vector<8x128xf32>
      %cst_192 = arith.constant 0.000000e+00 : f32
      %234 = vector.broadcast %cst_192 : f32 to vector<8x128xf32>
      %235 = arith.maximumf %233, %234 : vector<8x128xf32>
      %236 = arith.subf %219, %224 : vector<8x128xf32>
      %237 = arith.subf %arg12, %214 : vector<8x128xf32>
      %238 = arith.addf %236, %237 : vector<8x128xf32>
      %239 = arith.minimumf %14, %238 : vector<8x128xf32>
      %cst_193 = arith.constant 0.000000e+00 : f32
      %240 = vector.broadcast %cst_193 : f32 to vector<8x128xf32>
      %241 = arith.maximumf %239, %240 : vector<8x128xf32>
      %242 = arith.mulf %arg13, %46 : vector<8x128xf32>
      %243 = arith.mulf %204, %242 : vector<8x128xf32>
      %244 = arith.minimumf %arg13, %243 : vector<8x128xf32>
      %245 = arith.subf %204, %244 : vector<8x128xf32>
      %246 = arith.minimumf %arg14, %245 : vector<8x128xf32>
      %cst_194 = arith.constant 0.000000e+00 : f32
      %247 = vector.broadcast %cst_194 : f32 to vector<8x128xf32>
      %248 = arith.maximumf %246, %247 : vector<8x128xf32>
      %249 = arith.subf %204, %244 : vector<8x128xf32>
      %250 = arith.subf %249, %248 : vector<8x128xf32>
      %251 = arith.mulf %arg15, %56 : vector<8x128xf32>
      %252 = arith.mulf %250, %251 : vector<8x128xf32>
      %cst_195 = arith.constant 0.000000e+00 : f32
      %253 = vector.broadcast %cst_195 : f32 to vector<8x128xf32>
      %254 = arith.maximumf %252, %253 : vector<8x128xf32>
      %255 = arith.subf %arg15, %254 : vector<8x128xf32>
      %cst_196 = arith.constant 0.000000e+00 : f32
      %256 = vector.broadcast %cst_196 : f32 to vector<8x128xf32>
      %257 = arith.maximumf %255, %256 : vector<8x128xf32>
      %258 = arith.mulf %24, %204 : vector<8x128xf32>
      %259 = arith.addf %206, %209 : vector<8x128xf32>
      %260 = arith.addf %259, %214 : vector<8x128xf32>
      %261 = arith.addf %260, %244 : vector<8x128xf32>
      %262 = arith.addf %261, %248 : vector<8x128xf32>
      %263 = arith.addf %262, %254 : vector<8x128xf32>
      %264 = arith.addf %263, %258 : vector<8x128xf32>
      %265 = arith.addf %arg13, %arg14 : vector<8x128xf32>
      %266 = arith.subf %265, %244 : vector<8x128xf32>
      %267 = arith.subf %266, %248 : vector<8x128xf32>
      %268 = arith.addf %191, %267 : vector<8x128xf32>
      %269 = arith.subf %268, %51 : vector<8x128xf32>
      %cst_197 = arith.constant 0.000000e+00 : f32
      %270 = vector.broadcast %cst_197 : f32 to vector<8x128xf32>
      %271 = arith.maximumf %269, %270 : vector<8x128xf32>
      %272 = arith.mulf %271, %78 : vector<8x128xf32>
      %273 = arith.subf %arg13, %244 : vector<8x128xf32>
      %274 = arith.addf %273, %191 : vector<8x128xf32>
      %275 = arith.minimumf %10, %274 : vector<8x128xf32>
      %cst_198 = arith.constant 0.000000e+00 : f32
      %276 = vector.broadcast %cst_198 : f32 to vector<8x128xf32>
      %277 = arith.maximumf %275, %276 : vector<8x128xf32>
      %278 = arith.addf %arg13, %arg14 : vector<8x128xf32>
      %279 = arith.subf %278, %244 : vector<8x128xf32>
      %280 = arith.subf %279, %248 : vector<8x128xf32>
      %281 = arith.addf %191, %280 : vector<8x128xf32>
      %282 = arith.subf %281, %277 : vector<8x128xf32>
      %283 = arith.minimumf %12, %282 : vector<8x128xf32>
      %cst_199 = arith.constant 0.000000e+00 : f32
      %284 = vector.broadcast %cst_199 : f32 to vector<8x128xf32>
      %285 = arith.maximumf %283, %284 : vector<8x128xf32>
      %286 = arith.mulf %285, %30 : vector<8x128xf32>
      %287 = arith.subf %285, %286 : vector<8x128xf32>
      %cst_200 = arith.constant 0.000000e+00 : f32
      %288 = vector.broadcast %cst_200 : f32 to vector<8x128xf32>
      %289 = arith.maximumf %287, %288 : vector<8x128xf32>
      %290 = arith.addf %arg16, %arg17 : vector<8x128xf32>
      %291 = arith.addf %290, %257 : vector<8x128xf32>
      %292 = arith.mulf %291, %60 : vector<8x128xf32>
      %cst_201 = arith.constant 1.000000e+00 : f32
      %293 = vector.broadcast %cst_201 : f32 to vector<8x128xf32>
      %294 = arith.subf %293, %292 : vector<8x128xf32>
      %cst_202 = arith.constant 0.000000e+00 : f32
      %295 = vector.broadcast %cst_202 : f32 to vector<8x128xf32>
      %296 = arith.maximumf %294, %295 : vector<8x128xf32>
      %cst_203 = arith.constant 0.000000e+00 : f32
      %297 = vector.broadcast %cst_203 : f32 to vector<8x128xf32>
      %298 = arith.cmpf ogt, %296, %297 : vector<8x128xf32>
      %cst_204 = arith.constant 9.99999935E-39 : f32
      %299 = vector.broadcast %cst_204 : f32 to vector<8x128xf32>
      %300 = arith.maximumf %296, %299 : vector<8x128xf32>
      %301 = math.log %300 : vector<8x128xf32>
      %302 = arith.mulf %28, %301 : vector<8x128xf32>
      %303 = math.exp %302 : vector<8x128xf32>
      %cst_205 = arith.constant 0.000000e+00 : f32
      %304 = vector.broadcast %cst_205 : f32 to vector<8x128xf32>
      %305 = arith.select %298, %303, %304 : vector<8x128xi1>, vector<8x128xf32>
      %306 = arith.mulf %26, %305 : vector<8x128xf32>
      %cst_206 = arith.constant 1.000000e+00 : f32
      %307 = vector.broadcast %cst_206 : f32 to vector<8x128xf32>
      %308 = arith.addf %307, %306 : vector<8x128xf32>
      %309 = arith.mulf %63, %308 : vector<8x128xf32>
      %310 = arith.mulf %289, %50 : vector<8x128xf32>
      %311 = arith.mulf %309, %310 : vector<8x128xf32>
      %312 = arith.addf %arg16, %arg17 : vector<8x128xf32>
      %313 = arith.addf %312, %257 : vector<8x128xf32>
      %314 = arith.subf %58, %313 : vector<8x128xf32>
      %315 = arith.minimumf %311, %314 : vector<8x128xf32>
      %cst_207 = arith.constant 0.000000e+00 : f32
      %316 = vector.broadcast %cst_207 : f32 to vector<8x128xf32>
      %317 = arith.maximumf %315, %316 : vector<8x128xf32>
      %318 = arith.addf %arg16, %arg17 : vector<8x128xf32>
      %319 = arith.subf %57, %318 : vector<8x128xf32>
      %320 = arith.subf %14, %257 : vector<8x128xf32>
      %321 = arith.subf %317, %320 : vector<8x128xf32>
      %322 = arith.mulf %317, %22 : vector<8x128xf32>
      %323 = arith.maximumf %321, %322 : vector<8x128xf32>
      %324 = arith.minimumf %319, %323 : vector<8x128xf32>
      %cst_208 = arith.constant 0.000000e+00 : f32
      %325 = vector.broadcast %cst_208 : f32 to vector<8x128xf32>
      %326 = arith.maximumf %324, %325 : vector<8x128xf32>
      %327 = arith.subf %317, %326 : vector<8x128xf32>
      %cst_209 = arith.constant 0.000000e+00 : f32
      %328 = vector.broadcast %cst_209 : f32 to vector<8x128xf32>
      %329 = arith.maximumf %327, %328 : vector<8x128xf32>
      %330 = arith.subf %18, %arg17 : vector<8x128xf32>
      %331 = arith.subf %16, %arg16 : vector<8x128xf32>
      %332 = arith.subf %326, %331 : vector<8x128xf32>
      %333 = arith.mulf %75, %326 : vector<8x128xf32>
      %334 = arith.maximumf %332, %333 : vector<8x128xf32>
      %335 = arith.minimumf %330, %334 : vector<8x128xf32>
      %cst_210 = arith.constant 0.000000e+00 : f32
      %336 = vector.broadcast %cst_210 : f32 to vector<8x128xf32>
      %337 = arith.maximumf %335, %336 : vector<8x128xf32>
      %338 = arith.subf %326, %337 : vector<8x128xf32>
      %cst_211 = arith.constant 0.000000e+00 : f32
      %339 = vector.broadcast %cst_211 : f32 to vector<8x128xf32>
      %340 = arith.maximumf %338, %339 : vector<8x128xf32>
      %341 = arith.addf %257, %329 : vector<8x128xf32>
      %342 = arith.addf %arg16, %340 : vector<8x128xf32>
      %343 = arith.addf %arg17, %337 : vector<8x128xf32>
      %344 = arith.mulf %342, %32 : vector<8x128xf32>
      %345 = arith.subf %342, %344 : vector<8x128xf32>
      %cst_212 = arith.constant 0.000000e+00 : f32
      %346 = vector.broadcast %cst_212 : f32 to vector<8x128xf32>
      %347 = arith.maximumf %345, %346 : vector<8x128xf32>
      %348 = arith.mulf %343, %34 : vector<8x128xf32>
      %349 = arith.subf %343, %348 : vector<8x128xf32>
      %cst_213 = arith.constant 0.000000e+00 : f32
      %350 = vector.broadcast %cst_213 : f32 to vector<8x128xf32>
      %351 = arith.maximumf %349, %350 : vector<8x128xf32>
      %352 = arith.mulf %277, %46 : vector<8x128xf32>
      %353 = arith.mulf %289, %50 : vector<8x128xf32>
      %354 = arith.addf %277, %289 : vector<8x128xf32>
      %355 = arith.mulf %354, %53 : vector<8x128xf32>
      %356 = arith.cmpf olt, %352, %353 : vector<8x128xf32>
      %357 = arith.mulf %10, %355 : vector<8x128xf32>
      %358 = arith.select %356, %357, %277 : vector<8x128xi1>, vector<8x128xf32>
      %359 = arith.mulf %12, %355 : vector<8x128xf32>
      %360 = arith.select %356, %359, %289 : vector<8x128xi1>, vector<8x128xf32>
      %361 = arith.addf %342, %343 : vector<8x128xf32>
      %362 = arith.subf %361, %64 : vector<8x128xf32>
      %363 = arith.addf %362, %341 : vector<8x128xf32>
      %364 = arith.mulf %363, %68 : vector<8x128xf32>
      %cst_214 = arith.constant 0.000000e+00 : f32
      %365 = vector.broadcast %cst_214 : f32 to vector<8x128xf32>
      %366 = arith.maximumf %364, %365 : vector<8x128xf32>
      %367 = arith.mulf %341, %48 : vector<8x128xf32>
      %368 = arith.cmpf olt, %367, %366 : vector<8x128xf32>
      %369 = arith.mulf %14, %366 : vector<8x128xf32>
      %370 = arith.select %368, %369, %341 : vector<8x128xi1>, vector<8x128xf32>
      %371 = arith.subf %370, %341 : vector<8x128xf32>
      %372 = arith.subf %342, %371 : vector<8x128xf32>
      %cst_215 = arith.constant 0.000000e+00 : f32
      %373 = vector.broadcast %cst_215 : f32 to vector<8x128xf32>
      %374 = arith.maximumf %372, %373 : vector<8x128xf32>
      %375 = arith.select %368, %374, %347 : vector<8x128xi1>, vector<8x128xf32>
      %376 = arith.subf %370, %341 : vector<8x128xf32>
      %377 = arith.subf %376, %342 : vector<8x128xf32>
      %cst_216 = arith.constant 0.000000e+00 : f32
      %378 = vector.broadcast %cst_216 : f32 to vector<8x128xf32>
      %379 = arith.maximumf %377, %378 : vector<8x128xf32>
      %380 = arith.subf %343, %379 : vector<8x128xf32>
      %381 = arith.select %368, %380, %351 : vector<8x128xi1>, vector<8x128xf32>
      %382 = arith.addf %arg18, %arg19 : vector<8x128xf32>
      %383 = arith.addf %382, %arg20 : vector<8x128xf32>
      %384 = arith.addf %383, %arg21 : vector<8x128xf32>
      %385 = arith.addf %224, %230 : vector<8x128xf32>
      %386 = arith.mulf %385, %83 : vector<8x128xf32>
      %387 = arith.addf %205, %386 : vector<8x128xf32>
      %388 = arith.mulf %272, %80 : vector<8x128xf32>
      %389 = arith.addf %387, %388 : vector<8x128xf32>
      %cst_217 = arith.constant 1.000000e+03 : f32
      %390 = vector.broadcast %cst_217 : f32 to vector<8x128xf32>
      %391 = arith.mulf %389, %390 : vector<8x128xf32>
      %392 = arith.mulf %36, %arg19 : vector<8x128xf32>
      %393 = arith.mulf %286, %86 : vector<8x128xf32>
      %394 = arith.addf %392, %393 : vector<8x128xf32>
      %cst_218 = arith.constant 0.000000e+00 : f32
      %395 = vector.broadcast %cst_218 : f32 to vector<8x128xf32>
      %396 = arith.maximumf %394, %395 : vector<8x128xf32>
      %397 = arith.mulf %38, %arg20 : vector<8x128xf32>
      %398 = arith.mulf %344, %89 : vector<8x128xf32>
      %399 = arith.addf %397, %398 : vector<8x128xf32>
      %cst_219 = arith.constant 0.000000e+00 : f32
      %400 = vector.broadcast %cst_219 : f32 to vector<8x128xf32>
      %401 = arith.maximumf %399, %400 : vector<8x128xf32>
      %402 = arith.mulf %40, %arg21 : vector<8x128xf32>
      %403 = arith.mulf %348, %92 : vector<8x128xf32>
      %404 = arith.addf %402, %403 : vector<8x128xf32>
      %cst_220 = arith.constant 0.000000e+00 : f32
      %405 = vector.broadcast %cst_220 : f32 to vector<8x128xf32>
      %406 = arith.maximumf %404, %405 : vector<8x128xf32>
      %407 = arith.addf %391, %396 : vector<8x128xf32>
      %408 = arith.addf %407, %401 : vector<8x128xf32>
      %409 = arith.addf %408, %406 : vector<8x128xf32>
      %410 = arith.mulf %121, %384 : vector<8x128xf32>
      %411 = arith.mulf %109, %409 : vector<8x128xf32>
      %412 = arith.addf %410, %411 : vector<8x128xf32>
      %413 = arith.mulf %117, %arg22 : vector<8x128xf32>
      %414 = arith.addf %412, %413 : vector<8x128xf32>
      %415 = vector.shape_cast %264 : vector<8x128xf32> to vector<1x8x128xf32>
      %416 = arith.index_cast %186 : i32 to index
      %c0_221 = arith.constant 0 : index
      %c0_222 = arith.constant 0 : index
      %417 = vector.load %arg7[%416, %c0_221, %c0_222] : memref<16x8x128xf32, #tpu.memory_space<vmem>>, vector<1x8x128xf32>
      tpu.vector_store %arg7[%416, %c0_221, %c0_222], %415 {strides = array<i32>} : memref<16x8x128xf32, #tpu.memory_space<vmem>>, vector<1x8x128xf32>,
      %418 = vector.shape_cast %414 : vector<8x128xf32> to vector<1x8x128xf32>
      %419 = arith.index_cast %186 : i32 to index
      %c0_223 = arith.constant 0 : index
      %c0_224 = arith.constant 0 : index
      %420 = vector.load %arg6[%419, %c0_223, %c0_224] : memref<16x8x128xf32, #tpu.memory_space<vmem>>, vector<1x8x128xf32>
      tpu.vector_store %arg6[%419, %c0_223, %c0_224], %418 {strides = array<i32>} : memref<16x8x128xf32, #tpu.memory_space<vmem>>, vector<1x8x128xf32>,
      %421 = arith.addi %122, %186 : i32
      %c10_i32 = arith.constant 10 : i32
      %422 = arith.cmpi slt, %421, %c10_i32 : i32
      %423 = vector.broadcast %422 : i1 to vector<8x128xi1>
      %424 = arith.select %423, %235, %arg11 : vector<8x128xi1>, vector<8x128xf32>
      %425 = arith.select %423, %241, %arg12 : vector<8x128xi1>, vector<8x128xf32>
      %426 = arith.select %423, %358, %arg13 : vector<8x128xi1>, vector<8x128xf32>
      %427 = arith.select %423, %360, %arg14 : vector<8x128xi1>, vector<8x128xf32>
      %428 = arith.select %423, %370, %arg15 : vector<8x128xi1>, vector<8x128xf32>
      %429 = arith.select %423, %375, %arg16 : vector<8x128xi1>, vector<8x128xf32>
      %430 = arith.select %423, %381, %arg17 : vector<8x128xi1>, vector<8x128xf32>
      %431 = arith.select %423, %391, %arg18 : vector<8x128xi1>, vector<8x128xf32>
      %432 = arith.select %423, %396, %arg19 : vector<8x128xi1>, vector<8x128xf32>
      %433 = arith.select %423, %401, %arg20 : vector<8x128xi1>, vector<8x128xf32>
      %434 = arith.select %423, %406, %arg21 : vector<8x128xi1>, vector<8x128xf32>
      %435 = arith.select %423, %414, %arg22 : vector<8x128xi1>, vector<8x128xf32>
      %c1_i32_225 = arith.constant 1 : i32
      %436 = arith.addi %185, %c1_i32_225 : i32
      %437 = arith.index_cast %436 : i32 to index
      %c0_226 = arith.constant 0 : index
      %c0_227 = arith.constant 0 : index
      %438 = vector.load %arg2[%437, %c0_226, %c0_227] : memref<16x8x128xf32, #tpu.memory_space<vmem>>, vector<1x8x128xf32>
      %439 = vector.shape_cast %438 : vector<1x8x128xf32> to vector<8x128xf32>
      %cst_228 = arith.constant 0.000000e+00 : f32
      %440 = vector.broadcast %cst_228 : f32 to vector<8x128xf32>
      %441 = arith.maximumf %439, %440 : vector<8x128xf32>
      %442 = arith.index_cast %436 : i32 to index
      %c0_229 = arith.constant 0 : index
      %c0_230 = arith.constant 0 : index
      %443 = vector.load %arg3[%442, %c0_229, %c0_230] : memref<16x8x128xf32, #tpu.memory_space<vmem>>, vector<1x8x128xf32>
      %444 = vector.shape_cast %443 : vector<1x8x128xf32> to vector<8x128xf32>
      %445 = arith.cmpf one, %444, %444 : vector<8x128xf32>
      %446 = math.absf %444 : vector<8x128xf32>
      %cst_231 = arith.constant 0x7F800000 : f32
      %447 = vector.broadcast %cst_231 : f32 to vector<8x128xf32>
      %448 = arith.cmpf oeq, %446, %447 : vector<8x128xf32>
      %449 = arith.ori %445, %448 : vector<8x128xi1>
      %cst_232 = arith.constant 0.000000e+00 : f32
      %450 = vector.broadcast %cst_232 : f32 to vector<8x128xf32>
      %451 = arith.select %449, %450, %444 : vector<8x128xi1>, vector<8x128xf32>
      %cst_233 = arith.constant 0.000000e+00 : f32
      %452 = vector.broadcast %cst_233 : f32 to vector<8x128xf32>
      %453 = arith.maximumf %451, %452 : vector<8x128xf32>
      %454 = arith.mulf %4, %453 : vector<8x128xf32>
      %455 = arith.mulf %6, %441 : vector<8x128xf32>
      %456 = arith.mulf %6, %454 : vector<8x128xf32>
      %457 = arith.mulf %424, %46 : vector<8x128xf32>
      %458 = arith.mulf %454, %457 : vector<8x128xf32>
      %459 = arith.minimumf %424, %458 : vector<8x128xf32>
      %460 = arith.subf %454, %459 : vector<8x128xf32>
      %461 = arith.mulf %425, %56 : vector<8x128xf32>
      %462 = arith.mulf %460, %461 : vector<8x128xf32>
      %cst_234 = arith.constant 0.000000e+00 : f32
      %463 = vector.broadcast %cst_234 : f32 to vector<8x128xf32>
      %464 = arith.maximumf %462, %463 : vector<8x128xf32>
      %465 = arith.subf %424, %459 : vector<8x128xf32>
      %466 = arith.subf %10, %465 : vector<8x128xf32>
      %467 = arith.subf %441, %466 : vector<8x128xf32>
      %cst_235 = arith.constant 0.000000e+00 : f32
      %468 = vector.broadcast %cst_235 : f32 to vector<8x128xf32>
      %469 = arith.maximumf %467, %468 : vector<8x128xf32>
      %470 = arith.subf %425, %464 : vector<8x128xf32>
      %471 = arith.mulf %470, %48 : vector<8x128xf32>
      %472 = arith.mulf %469, %471 : vector<8x128xf32>
      %cst_236 = arith.constant 0.000000e+00 : f32
      %473 = vector.broadcast %cst_236 : f32 to vector<8x128xf32>
      %474 = arith.maximumf %472, %473 : vector<8x128xf32>
      %475 = arith.subf %469, %474 : vector<8x128xf32>
      %476 = arith.subf %425, %464 : vector<8x128xf32>
      %477 = arith.addf %475, %476 : vector<8x128xf32>
      %478 = arith.subf %477, %14 : vector<8x128xf32>
      %cst_237 = arith.constant 0.000000e+00 : f32
      %479 = vector.broadcast %cst_237 : f32 to vector<8x128xf32>
      %480 = arith.maximumf %478, %479 : vector<8x128xf32>
      %481 = arith.subf %424, %459 : vector<8x128xf32>
      %482 = arith.addf %481, %441 : vector<8x128xf32>
      %483 = arith.minimumf %10, %482 : vector<8x128xf32>
      %cst_238 = arith.constant 0.000000e+00 : f32
      %484 = vector.broadcast %cst_238 : f32 to vector<8x128xf32>
      %485 = arith.maximumf %483, %484 : vector<8x128xf32>
      %486 = arith.subf %469, %474 : vector<8x128xf32>
      %487 = arith.subf %425, %464 : vector<8x128xf32>
      %488 = arith.addf %486, %487 : vector<8x128xf32>
      %489 = arith.minimumf %14, %488 : vector<8x128xf32>
      %cst_239 = arith.constant 0.000000e+00 : f32
      %490 = vector.broadcast %cst_239 : f32 to vector<8x128xf32>
      %491 = arith.maximumf %489, %490 : vector<8x128xf32>
      %492 = arith.mulf %426, %46 : vector<8x128xf32>
      %493 = arith.mulf %454, %492 : vector<8x128xf32>
      %494 = arith.minimumf %426, %493 : vector<8x128xf32>
      %495 = arith.subf %454, %494 : vector<8x128xf32>
      %496 = arith.minimumf %427, %495 : vector<8x128xf32>
      %cst_240 = arith.constant 0.000000e+00 : f32
      %497 = vector.broadcast %cst_240 : f32 to vector<8x128xf32>
      %498 = arith.maximumf %496, %497 : vector<8x128xf32>
      %499 = arith.subf %454, %494 : vector<8x128xf32>
      %500 = arith.subf %499, %498 : vector<8x128xf32>
      %501 = arith.mulf %428, %56 : vector<8x128xf32>
      %502 = arith.mulf %500, %501 : vector<8x128xf32>
      %cst_241 = arith.constant 0.000000e+00 : f32
      %503 = vector.broadcast %cst_241 : f32 to vector<8x128xf32>
      %504 = arith.maximumf %502, %503 : vector<8x128xf32>
      %505 = arith.subf %428, %504 : vector<8x128xf32>
      %cst_242 = arith.constant 0.000000e+00 : f32
      %506 = vector.broadcast %cst_242 : f32 to vector<8x128xf32>
      %507 = arith.maximumf %505, %506 : vector<8x128xf32>
      %508 = arith.mulf %24, %454 : vector<8x128xf32>
      %509 = arith.addf %456, %459 : vector<8x128xf32>
      %510 = arith.addf %509, %464 : vector<8x128xf32>
      %511 = arith.addf %510, %494 : vector<8x128xf32>
      %512 = arith.addf %511, %498 : vector<8x128xf32>
      %513 = arith.addf %512, %504 : vector<8x128xf32>
      %514 = arith.addf %513, %508 : vector<8x128xf32>
      %515 = arith.addf %426, %427 : vector<8x128xf32>
      %516 = arith.subf %515, %494 : vector<8x128xf32>
      %517 = arith.subf %516, %498 : vector<8x128xf32>
      %518 = arith.addf %441, %517 : vector<8x128xf32>
      %519 = arith.subf %518, %51 : vector<8x128xf32>
      %cst_243 = arith.constant 0.000000e+00 : f32
      %520 = vector.broadcast %cst_243 : f32 to vector<8x128xf32>
      %521 = arith.maximumf %519, %520 : vector<8x128xf32>
      %522 = arith.mulf %521, %78 : vector<8x128xf32>
      %523 = arith.subf %426, %494 : vector<8x128xf32>
      %524 = arith.addf %523, %441 : vector<8x128xf32>
      %525 = arith.minimumf %10, %524 : vector<8x128xf32>
      %cst_244 = arith.constant 0.000000e+00 : f32
      %526 = vector.broadcast %cst_244 : f32 to vector<8x128xf32>
      %527 = arith.maximumf %525, %526 : vector<8x128xf32>
      %528 = arith.addf %426, %427 : vector<8x128xf32>
      %529 = arith.subf %528, %494 : vector<8x128xf32>
      %530 = arith.subf %529, %498 : vector<8x128xf32>
      %531 = arith.addf %441, %530 : vector<8x128xf32>
      %532 = arith.subf %531, %527 : vector<8x128xf32>
      %533 = arith.minimumf %12, %532 : vector<8x128xf32>
      %cst_245 = arith.constant 0.000000e+00 : f32
      %534 = vector.broadcast %cst_245 : f32 to vector<8x128xf32>
      %535 = arith.maximumf %533, %534 : vector<8x128xf32>
      %536 = arith.mulf %535, %30 : vector<8x128xf32>
      %537 = arith.subf %535, %536 : vector<8x128xf32>
      %cst_246 = arith.constant 0.000000e+00 : f32
      %538 = vector.broadcast %cst_246 : f32 to vector<8x128xf32>
      %539 = arith.maximumf %537, %538 : vector<8x128xf32>
      %540 = arith.addf %429, %430 : vector<8x128xf32>
      %541 = arith.addf %540, %507 : vector<8x128xf32>
      %542 = arith.mulf %541, %60 : vector<8x128xf32>
      %cst_247 = arith.constant 1.000000e+00 : f32
      %543 = vector.broadcast %cst_247 : f32 to vector<8x128xf32>
      %544 = arith.subf %543, %542 : vector<8x128xf32>
      %cst_248 = arith.constant 0.000000e+00 : f32
      %545 = vector.broadcast %cst_248 : f32 to vector<8x128xf32>
      %546 = arith.maximumf %544, %545 : vector<8x128xf32>
      %cst_249 = arith.constant 0.000000e+00 : f32
      %547 = vector.broadcast %cst_249 : f32 to vector<8x128xf32>
      %548 = arith.cmpf ogt, %546, %547 : vector<8x128xf32>
      %cst_250 = arith.constant 9.99999935E-39 : f32
      %549 = vector.broadcast %cst_250 : f32 to vector<8x128xf32>
      %550 = arith.maximumf %546, %549 : vector<8x128xf32>
      %551 = math.log %550 : vector<8x128xf32>
      %552 = arith.mulf %28, %551 : vector<8x128xf32>
      %553 = math.exp %552 : vector<8x128xf32>
      %cst_251 = arith.constant 0.000000e+00 : f32
      %554 = vector.broadcast %cst_251 : f32 to vector<8x128xf32>
      %555 = arith.select %548, %553, %554 : vector<8x128xi1>, vector<8x128xf32>
      %556 = arith.mulf %26, %555 : vector<8x128xf32>
      %cst_252 = arith.constant 1.000000e+00 : f32
      %557 = vector.broadcast %cst_252 : f32 to vector<8x128xf32>
      %558 = arith.addf %557, %556 : vector<8x128xf32>
      %559 = arith.mulf %63, %558 : vector<8x128xf32>
      %560 = arith.mulf %539, %50 : vector<8x128xf32>
      %561 = arith.mulf %559, %560 : vector<8x128xf32>
      %562 = arith.addf %429, %430 : vector<8x128xf32>
      %563 = arith.addf %562, %507 : vector<8x128xf32>
      %564 = arith.subf %58, %563 : vector<8x128xf32>
      %565 = arith.minimumf %561, %564 : vector<8x128xf32>
      %cst_253 = arith.constant 0.000000e+00 : f32
      %566 = vector.broadcast %cst_253 : f32 to vector<8x128xf32>
      %567 = arith.maximumf %565, %566 : vector<8x128xf32>
      %568 = arith.addf %429, %430 : vector<8x128xf32>
      %569 = arith.subf %57, %568 : vector<8x128xf32>
      %570 = arith.subf %14, %507 : vector<8x128xf32>
      %571 = arith.subf %567, %570 : vector<8x128xf32>
      %572 = arith.mulf %567, %22 : vector<8x128xf32>
      %573 = arith.maximumf %571, %572 : vector<8x128xf32>
      %574 = arith.minimumf %569, %573 : vector<8x128xf32>
      %cst_254 = arith.constant 0.000000e+00 : f32
      %575 = vector.broadcast %cst_254 : f32 to vector<8x128xf32>
      %576 = arith.maximumf %574, %575 : vector<8x128xf32>
      %577 = arith.subf %567, %576 : vector<8x128xf32>
      %cst_255 = arith.constant 0.000000e+00 : f32
      %578 = vector.broadcast %cst_255 : f32 to vector<8x128xf32>
      %579 = arith.maximumf %577, %578 : vector<8x128xf32>
      %580 = arith.subf %18, %430 : vector<8x128xf32>
      %581 = arith.subf %16, %429 : vector<8x128xf32>
      %582 = arith.subf %576, %581 : vector<8x128xf32>
      %583 = arith.mulf %75, %576 : vector<8x128xf32>
      %584 = arith.maximumf %582, %583 : vector<8x128xf32>
      %585 = arith.minimumf %580, %584 : vector<8x128xf32>
      %cst_256 = arith.constant 0.000000e+00 : f32
      %586 = vector.broadcast %cst_256 : f32 to vector<8x128xf32>
      %587 = arith.maximumf %585, %586 : vector<8x128xf32>
      %588 = arith.subf %576, %587 : vector<8x128xf32>
      %cst_257 = arith.constant 0.000000e+00 : f32
      %589 = vector.broadcast %cst_257 : f32 to vector<8x128xf32>
      %590 = arith.maximumf %588, %589 : vector<8x128xf32>
      %591 = arith.addf %507, %579 : vector<8x128xf32>
      %592 = arith.addf %429, %590 : vector<8x128xf32>
      %593 = arith.addf %430, %587 : vector<8x128xf32>
      %594 = arith.mulf %592, %32 : vector<8x128xf32>
      %595 = arith.subf %592, %594 : vector<8x128xf32>
      %cst_258 = arith.constant 0.000000e+00 : f32
      %596 = vector.broadcast %cst_258 : f32 to vector<8x128xf32>
      %597 = arith.maximumf %595, %596 : vector<8x128xf32>
      %598 = arith.mulf %593, %34 : vector<8x128xf32>
      %599 = arith.subf %593, %598 : vector<8x128xf32>
      %cst_259 = arith.constant 0.000000e+00 : f32
      %600 = vector.broadcast %cst_259 : f32 to vector<8x128xf32>
      %601 = arith.maximumf %599, %600 : vector<8x128xf32>
      %602 = arith.mulf %527, %46 : vector<8x128xf32>
      %603 = arith.mulf %539, %50 : vector<8x128xf32>
      %604 = arith.addf %527, %539 : vector<8x128xf32>
      %605 = arith.mulf %604, %53 : vector<8x128xf32>
      %606 = arith.cmpf olt, %602, %603 : vector<8x128xf32>
      %607 = arith.mulf %10, %605 : vector<8x128xf32>
      %608 = arith.select %606, %607, %527 : vector<8x128xi1>, vector<8x128xf32>
      %609 = arith.mulf %12, %605 : vector<8x128xf32>
      %610 = arith.select %606, %609, %539 : vector<8x128xi1>, vector<8x128xf32>
      %611 = arith.addf %592, %593 : vector<8x128xf32>
      %612 = arith.subf %611, %64 : vector<8x128xf32>
      %613 = arith.addf %612, %591 : vector<8x128xf32>
      %614 = arith.mulf %613, %68 : vector<8x128xf32>
      %cst_260 = arith.constant 0.000000e+00 : f32
      %615 = vector.broadcast %cst_260 : f32 to vector<8x128xf32>
      %616 = arith.maximumf %614, %615 : vector<8x128xf32>
      %617 = arith.mulf %591, %48 : vector<8x128xf32>
      %618 = arith.cmpf olt, %617, %616 : vector<8x128xf32>
      %619 = arith.mulf %14, %616 : vector<8x128xf32>
      %620 = arith.select %618, %619, %591 : vector<8x128xi1>, vector<8x128xf32>
      %621 = arith.subf %620, %591 : vector<8x128xf32>
      %622 = arith.subf %592, %621 : vector<8x128xf32>
      %cst_261 = arith.constant 0.000000e+00 : f32
      %623 = vector.broadcast %cst_261 : f32 to vector<8x128xf32>
      %624 = arith.maximumf %622, %623 : vector<8x128xf32>
      %625 = arith.select %618, %624, %597 : vector<8x128xi1>, vector<8x128xf32>
      %626 = arith.subf %620, %591 : vector<8x128xf32>
      %627 = arith.subf %626, %592 : vector<8x128xf32>
      %cst_262 = arith.constant 0.000000e+00 : f32
      %628 = vector.broadcast %cst_262 : f32 to vector<8x128xf32>
      %629 = arith.maximumf %627, %628 : vector<8x128xf32>
      %630 = arith.subf %593, %629 : vector<8x128xf32>
      %631 = arith.select %618, %630, %601 : vector<8x128xi1>, vector<8x128xf32>
      %632 = arith.addf %431, %432 : vector<8x128xf32>
      %633 = arith.addf %632, %433 : vector<8x128xf32>
      %634 = arith.addf %633, %434 : vector<8x128xf32>
      %635 = arith.addf %474, %480 : vector<8x128xf32>
      %636 = arith.mulf %635, %83 : vector<8x128xf32>
      %637 = arith.addf %455, %636 : vector<8x128xf32>
      %638 = arith.mulf %522, %80 : vector<8x128xf32>
      %639 = arith.addf %637, %638 : vector<8x128xf32>
      %cst_263 = arith.constant 1.000000e+03 : f32
      %640 = vector.broadcast %cst_263 : f32 to vector<8x128xf32>
      %641 = arith.mulf %639, %640 : vector<8x128xf32>
      %642 = arith.mulf %36, %432 : vector<8x128xf32>
      %643 = arith.mulf %536, %86 : vector<8x128xf32>
      %644 = arith.addf %642, %643 : vector<8x128xf32>
      %cst_264 = arith.constant 0.000000e+00 : f32
      %645 = vector.broadcast %cst_264 : f32 to vector<8x128xf32>
      %646 = arith.maximumf %644, %645 : vector<8x128xf32>
      %647 = arith.mulf %38, %433 : vector<8x128xf32>
      %648 = arith.mulf %594, %89 : vector<8x128xf32>
      %649 = arith.addf %647, %648 : vector<8x128xf32>
      %cst_265 = arith.constant 0.000000e+00 : f32
      %650 = vector.broadcast %cst_265 : f32 to vector<8x128xf32>
      %651 = arith.maximumf %649, %650 : vector<8x128xf32>
      %652 = arith.mulf %40, %434 : vector<8x128xf32>
      %653 = arith.mulf %598, %92 : vector<8x128xf32>
      %654 = arith.addf %652, %653 : vector<8x128xf32>
      %cst_266 = arith.constant 0.000000e+00 : f32
      %655 = vector.broadcast %cst_266 : f32 to vector<8x128xf32>
      %656 = arith.maximumf %654, %655 : vector<8x128xf32>
      %657 = arith.addf %641, %646 : vector<8x128xf32>
      %658 = arith.addf %657, %651 : vector<8x128xf32>
      %659 = arith.addf %658, %656 : vector<8x128xf32>
      %660 = arith.mulf %121, %634 : vector<8x128xf32>
      %661 = arith.mulf %109, %659 : vector<8x128xf32>
      %662 = arith.addf %660, %661 : vector<8x128xf32>
      %663 = arith.mulf %117, %435 : vector<8x128xf32>
      %664 = arith.addf %662, %663 : vector<8x128xf32>
      %665 = vector.shape_cast %514 : vector<8x128xf32> to vector<1x8x128xf32>
      %666 = arith.index_cast %436 : i32 to index
      %c0_267 = arith.constant 0 : index
      %c0_268 = arith.constant 0 : index
      %667 = vector.load %arg7[%666, %c0_267, %c0_268] : memref<16x8x128xf32, #tpu.memory_space<vmem>>, vector<1x8x128xf32>
      tpu.vector_store %arg7[%666, %c0_267, %c0_268], %665 {strides = array<i32>} : memref<16x8x128xf32, #tpu.memory_space<vmem>>, vector<1x8x128xf32>,
      %668 = vector.shape_cast %664 : vector<8x128xf32> to vector<1x8x128xf32>
      %669 = arith.index_cast %436 : i32 to index
      %c0_269 = arith.constant 0 : index
      %c0_270 = arith.constant 0 : index
      %670 = vector.load %arg6[%669, %c0_269, %c0_270] : memref<16x8x128xf32, #tpu.memory_space<vmem>>, vector<1x8x128xf32>
      tpu.vector_store %arg6[%669, %c0_269, %c0_270], %668 {strides = array<i32>} : memref<16x8x128xf32, #tpu.memory_space<vmem>>, vector<1x8x128xf32>,
      %671 = arith.addi %122, %436 : i32
      %c10_i32_271 = arith.constant 10 : i32
      %672 = arith.cmpi slt, %671, %c10_i32_271 : i32
      %673 = vector.broadcast %672 : i1 to vector<8x128xi1>
      %674 = arith.select %673, %485, %424 : vector<8x128xi1>, vector<8x128xf32>
      %675 = arith.select %673, %491, %425 : vector<8x128xi1>, vector<8x128xf32>
      %676 = arith.select %673, %608, %426 : vector<8x128xi1>, vector<8x128xf32>
      %677 = arith.select %673, %610, %427 : vector<8x128xi1>, vector<8x128xf32>
      %678 = arith.select %673, %620, %428 : vector<8x128xi1>, vector<8x128xf32>
      %679 = arith.select %673, %625, %429 : vector<8x128xi1>, vector<8x128xf32>
      %680 = arith.select %673, %631, %430 : vector<8x128xi1>, vector<8x128xf32>
      %681 = arith.select %673, %641, %431 : vector<8x128xi1>, vector<8x128xf32>
      %682 = arith.select %673, %646, %432 : vector<8x128xi1>, vector<8x128xf32>
      %683 = arith.select %673, %651, %433 : vector<8x128xi1>, vector<8x128xf32>
      %684 = arith.select %673, %656, %434 : vector<8x128xi1>, vector<8x128xf32>
      %685 = arith.select %673, %664, %435 : vector<8x128xi1>, vector<8x128xf32>
      scf.yield %674, %675, %676, %677, %678, %679, %680, %681, %682, %683, %684, %685 : vector<8x128xf32>, vector<8x128xf32>, vector<8x128xf32>, vector<8x128xf32>, vector<8x128xf32>, vector<8x128xf32>, vector<8x128xf32>, vector<8x128xf32>, vector<8x128xf32>, vector<8x128xf32>, vector<8x128xf32>, vector<8x128xf32>
    }
    %c8_i32_106 = arith.constant 8 : i32
    %149 = vector.shape_cast %148#0 : vector<8x128xf32> to vector<1x8x128xf32>
    %c0_107 = arith.constant 0 : index
    %c0_108 = arith.constant 0 : index
    %c0_109 = arith.constant 0 : index
    %150 = vector.load %arg9[%c0_107, %c0_108, %c0_109] : memref<12x8x128xf32, #tpu.memory_space<vmem>>, vector<1x8x128xf32>
    tpu.vector_store %arg9[%c0_107, %c0_108, %c0_109], %149 {strides = array<i32>} : memref<12x8x128xf32, #tpu.memory_space<vmem>>, vector<1x8x128xf32>,
    %c0_110 = arith.constant 0 : index
    %c0_111 = arith.constant 0 : index
    %c0_112 = arith.constant 0 : index
    %151 = vector.load %arg8[%c0_110, %c0_111, %c0_112] : memref<12x8x128xf32, #tpu.memory_space<vmem>>, vector<1x8x128xf32>
    tpu.vector_store %arg8[%c0_110, %c0_111, %c0_112], %149 {strides = array<i32>} : memref<12x8x128xf32, #tpu.memory_space<vmem>>, vector<1x8x128xf32>,
    %152 = vector.shape_cast %148#1 : vector<8x128xf32> to vector<1x8x128xf32>
    %c1_113 = arith.constant 1 : index
    %c0_114 = arith.constant 0 : index
    %c0_115 = arith.constant 0 : index
    %153 = vector.load %arg9[%c1_113, %c0_114, %c0_115] : memref<12x8x128xf32, #tpu.memory_space<vmem>>, vector<1x8x128xf32>
    tpu.vector_store %arg9[%c1_113, %c0_114, %c0_115], %152 {strides = array<i32>} : memref<12x8x128xf32, #tpu.memory_space<vmem>>, vector<1x8x128xf32>,
    %c1_116 = arith.constant 1 : index
    %c0_117 = arith.constant 0 : index
    %c0_118 = arith.constant 0 : index
    %154 = vector.load %arg8[%c1_116, %c0_117, %c0_118] : memref<12x8x128xf32, #tpu.memory_space<vmem>>, vector<1x8x128xf32>
    tpu.vector_store %arg8[%c1_116, %c0_117, %c0_118], %152 {strides = array<i32>} : memref<12x8x128xf32, #tpu.memory_space<vmem>>, vector<1x8x128xf32>,
    %155 = vector.shape_cast %148#2 : vector<8x128xf32> to vector<1x8x128xf32>
    %c2_119 = arith.constant 2 : index
    %c0_120 = arith.constant 0 : index
    %c0_121 = arith.constant 0 : index
    %156 = vector.load %arg9[%c2_119, %c0_120, %c0_121] : memref<12x8x128xf32, #tpu.memory_space<vmem>>, vector<1x8x128xf32>
    tpu.vector_store %arg9[%c2_119, %c0_120, %c0_121], %155 {strides = array<i32>} : memref<12x8x128xf32, #tpu.memory_space<vmem>>, vector<1x8x128xf32>,
    %c2_122 = arith.constant 2 : index
    %c0_123 = arith.constant 0 : index
    %c0_124 = arith.constant 0 : index
    %157 = vector.load %arg8[%c2_122, %c0_123, %c0_124] : memref<12x8x128xf32, #tpu.memory_space<vmem>>, vector<1x8x128xf32>
    tpu.vector_store %arg8[%c2_122, %c0_123, %c0_124], %155 {strides = array<i32>} : memref<12x8x128xf32, #tpu.memory_space<vmem>>, vector<1x8x128xf32>,
    %158 = vector.shape_cast %148#3 : vector<8x128xf32> to vector<1x8x128xf32>
    %c3_125 = arith.constant 3 : index
    %c0_126 = arith.constant 0 : index
    %c0_127 = arith.constant 0 : index
    %159 = vector.load %arg9[%c3_125, %c0_126, %c0_127] : memref<12x8x128xf32, #tpu.memory_space<vmem>>, vector<1x8x128xf32>
    tpu.vector_store %arg9[%c3_125, %c0_126, %c0_127], %158 {strides = array<i32>} : memref<12x8x128xf32, #tpu.memory_space<vmem>>, vector<1x8x128xf32>,
    %c3_128 = arith.constant 3 : index
    %c0_129 = arith.constant 0 : index
    %c0_130 = arith.constant 0 : index
    %160 = vector.load %arg8[%c3_128, %c0_129, %c0_130] : memref<12x8x128xf32, #tpu.memory_space<vmem>>, vector<1x8x128xf32>
    tpu.vector_store %arg8[%c3_128, %c0_129, %c0_130], %158 {strides = array<i32>} : memref<12x8x128xf32, #tpu.memory_space<vmem>>, vector<1x8x128xf32>,
    %161 = vector.shape_cast %148#4 : vector<8x128xf32> to vector<1x8x128xf32>
    %c4_131 = arith.constant 4 : index
    %c0_132 = arith.constant 0 : index
    %c0_133 = arith.constant 0 : index
    %162 = vector.load %arg9[%c4_131, %c0_132, %c0_133] : memref<12x8x128xf32, #tpu.memory_space<vmem>>, vector<1x8x128xf32>
    tpu.vector_store %arg9[%c4_131, %c0_132, %c0_133], %161 {strides = array<i32>} : memref<12x8x128xf32, #tpu.memory_space<vmem>>, vector<1x8x128xf32>,
    %c4_134 = arith.constant 4 : index
    %c0_135 = arith.constant 0 : index
    %c0_136 = arith.constant 0 : index
    %163 = vector.load %arg8[%c4_134, %c0_135, %c0_136] : memref<12x8x128xf32, #tpu.memory_space<vmem>>, vector<1x8x128xf32>
    tpu.vector_store %arg8[%c4_134, %c0_135, %c0_136], %161 {strides = array<i32>} : memref<12x8x128xf32, #tpu.memory_space<vmem>>, vector<1x8x128xf32>,
    %164 = vector.shape_cast %148#5 : vector<8x128xf32> to vector<1x8x128xf32>
    %c5_137 = arith.constant 5 : index
    %c0_138 = arith.constant 0 : index
    %c0_139 = arith.constant 0 : index
    %165 = vector.load %arg9[%c5_137, %c0_138, %c0_139] : memref<12x8x128xf32, #tpu.memory_space<vmem>>, vector<1x8x128xf32>
    tpu.vector_store %arg9[%c5_137, %c0_138, %c0_139], %164 {strides = array<i32>} : memref<12x8x128xf32, #tpu.memory_space<vmem>>, vector<1x8x128xf32>,
    %c5_140 = arith.constant 5 : index
    %c0_141 = arith.constant 0 : index
    %c0_142 = arith.constant 0 : index
    %166 = vector.load %arg8[%c5_140, %c0_141, %c0_142] : memref<12x8x128xf32, #tpu.memory_space<vmem>>, vector<1x8x128xf32>
    tpu.vector_store %arg8[%c5_140, %c0_141, %c0_142], %164 {strides = array<i32>} : memref<12x8x128xf32, #tpu.memory_space<vmem>>, vector<1x8x128xf32>,
    %167 = vector.shape_cast %148#6 : vector<8x128xf32> to vector<1x8x128xf32>
    %c6_143 = arith.constant 6 : index
    %c0_144 = arith.constant 0 : index
    %c0_145 = arith.constant 0 : index
    %168 = vector.load %arg9[%c6_143, %c0_144, %c0_145] : memref<12x8x128xf32, #tpu.memory_space<vmem>>, vector<1x8x128xf32>
    tpu.vector_store %arg9[%c6_143, %c0_144, %c0_145], %167 {strides = array<i32>} : memref<12x8x128xf32, #tpu.memory_space<vmem>>, vector<1x8x128xf32>,
    %c6_146 = arith.constant 6 : index
    %c0_147 = arith.constant 0 : index
    %c0_148 = arith.constant 0 : index
    %169 = vector.load %arg8[%c6_146, %c0_147, %c0_148] : memref<12x8x128xf32, #tpu.memory_space<vmem>>, vector<1x8x128xf32>
    tpu.vector_store %arg8[%c6_146, %c0_147, %c0_148], %167 {strides = array<i32>} : memref<12x8x128xf32, #tpu.memory_space<vmem>>, vector<1x8x128xf32>,
    %170 = vector.shape_cast %148#7 : vector<8x128xf32> to vector<1x8x128xf32>
    %c7_149 = arith.constant 7 : index
    %c0_150 = arith.constant 0 : index
    %c0_151 = arith.constant 0 : index
    %171 = vector.load %arg9[%c7_149, %c0_150, %c0_151] : memref<12x8x128xf32, #tpu.memory_space<vmem>>, vector<1x8x128xf32>
    tpu.vector_store %arg9[%c7_149, %c0_150, %c0_151], %170 {strides = array<i32>} : memref<12x8x128xf32, #tpu.memory_space<vmem>>, vector<1x8x128xf32>,
    %c7_152 = arith.constant 7 : index
    %c0_153 = arith.constant 0 : index
    %c0_154 = arith.constant 0 : index
    %172 = vector.load %arg8[%c7_152, %c0_153, %c0_154] : memref<12x8x128xf32, #tpu.memory_space<vmem>>, vector<1x8x128xf32>
    tpu.vector_store %arg8[%c7_152, %c0_153, %c0_154], %170 {strides = array<i32>} : memref<12x8x128xf32, #tpu.memory_space<vmem>>, vector<1x8x128xf32>,
    %173 = vector.shape_cast %148#8 : vector<8x128xf32> to vector<1x8x128xf32>
    %c8_155 = arith.constant 8 : index
    %c0_156 = arith.constant 0 : index
    %c0_157 = arith.constant 0 : index
    %174 = vector.load %arg9[%c8_155, %c0_156, %c0_157] : memref<12x8x128xf32, #tpu.memory_space<vmem>>, vector<1x8x128xf32>
    tpu.vector_store %arg9[%c8_155, %c0_156, %c0_157], %173 {strides = array<i32>} : memref<12x8x128xf32, #tpu.memory_space<vmem>>, vector<1x8x128xf32>,
    %c8_158 = arith.constant 8 : index
    %c0_159 = arith.constant 0 : index
    %c0_160 = arith.constant 0 : index
    %175 = vector.load %arg8[%c8_158, %c0_159, %c0_160] : memref<12x8x128xf32, #tpu.memory_space<vmem>>, vector<1x8x128xf32>
    tpu.vector_store %arg8[%c8_158, %c0_159, %c0_160], %173 {strides = array<i32>} : memref<12x8x128xf32, #tpu.memory_space<vmem>>, vector<1x8x128xf32>,
    %176 = vector.shape_cast %148#9 : vector<8x128xf32> to vector<1x8x128xf32>
    %c9_161 = arith.constant 9 : index
    %c0_162 = arith.constant 0 : index
    %c0_163 = arith.constant 0 : index
    %177 = vector.load %arg9[%c9_161, %c0_162, %c0_163] : memref<12x8x128xf32, #tpu.memory_space<vmem>>, vector<1x8x128xf32>
    tpu.vector_store %arg9[%c9_161, %c0_162, %c0_163], %176 {strides = array<i32>} : memref<12x8x128xf32, #tpu.memory_space<vmem>>, vector<1x8x128xf32>,
    %c9_164 = arith.constant 9 : index
    %c0_165 = arith.constant 0 : index
    %c0_166 = arith.constant 0 : index
    %178 = vector.load %arg8[%c9_164, %c0_165, %c0_166] : memref<12x8x128xf32, #tpu.memory_space<vmem>>, vector<1x8x128xf32>
    tpu.vector_store %arg8[%c9_164, %c0_165, %c0_166], %176 {strides = array<i32>} : memref<12x8x128xf32, #tpu.memory_space<vmem>>, vector<1x8x128xf32>,
    %179 = vector.shape_cast %148#10 : vector<8x128xf32> to vector<1x8x128xf32>
    %c10_167 = arith.constant 10 : index
    %c0_168 = arith.constant 0 : index
    %c0_169 = arith.constant 0 : index
    %180 = vector.load %arg9[%c10_167, %c0_168, %c0_169] : memref<12x8x128xf32, #tpu.memory_space<vmem>>, vector<1x8x128xf32>
    tpu.vector_store %arg9[%c10_167, %c0_168, %c0_169], %179 {strides = array<i32>} : memref<12x8x128xf32, #tpu.memory_space<vmem>>, vector<1x8x128xf32>,
    %c10_170 = arith.constant 10 : index
    %c0_171 = arith.constant 0 : index
    %c0_172 = arith.constant 0 : index
    %181 = vector.load %arg8[%c10_170, %c0_171, %c0_172] : memref<12x8x128xf32, #tpu.memory_space<vmem>>, vector<1x8x128xf32>
    tpu.vector_store %arg8[%c10_170, %c0_171, %c0_172], %179 {strides = array<i32>} : memref<12x8x128xf32, #tpu.memory_space<vmem>>, vector<1x8x128xf32>,
    %182 = vector.shape_cast %148#11 : vector<8x128xf32> to vector<1x8x128xf32>
    %c11_173 = arith.constant 11 : index
    %c0_174 = arith.constant 0 : index
    %c0_175 = arith.constant 0 : index
    %183 = vector.load %arg9[%c11_173, %c0_174, %c0_175] : memref<12x8x128xf32, #tpu.memory_space<vmem>>, vector<1x8x128xf32>
    tpu.vector_store %arg9[%c11_173, %c0_174, %c0_175], %182 {strides = array<i32>} : memref<12x8x128xf32, #tpu.memory_space<vmem>>, vector<1x8x128xf32>,
    %c11_176 = arith.constant 11 : index
    %c0_177 = arith.constant 0 : index
    %c0_178 = arith.constant 0 : index
    %184 = vector.load %arg8[%c11_176, %c0_177, %c0_178] : memref<12x8x128xf32, #tpu.memory_space<vmem>>, vector<1x8x128xf32>
    tpu.vector_store %arg8[%c11_176, %c0_177, %c0_178], %182 {strides = array<i32>} : memref<12x8x128xf32, #tpu.memory_space<vmem>>, vector<1x8x128xf32>,
    return
  }
  func.func @transform_0(%arg0: i32, %arg1: i32) -> (i32, i32, i32) {
    %c0_i32 = arith.constant 0 : i32
    %c0_i32_0 = arith.constant 0 : i32
    return %arg1, %arg0, %c0_i32 : i32, i32, i32
  }
  func.func @transform_1(%arg0: i32, %arg1: i32) -> (i32, i32, i32) {
    %c0_i32 = arith.constant 0 : i32
    %c0_i32_0 = arith.constant 0 : i32
    return %arg1, %arg0, %c0_i32 : i32, i32, i32
  }
  func.func @transform_2(%arg0: i32, %arg1: i32) -> (i32, i32, i32) {
    %c0_i32 = arith.constant 0 : i32
    %c0_i32_0 = arith.constant 0 : i32
    %c0_i32_1 = arith.constant 0 : i32
    return %c0_i32, %arg0, %c0_i32_0 : i32, i32, i32
  }
  func.func @transform_3(%arg0: i32, %arg1: i32) -> (i32, i32, i32) {
    %c0_i32 = arith.constant 0 : i32
    %c0_i32_0 = arith.constant 0 : i32
    %c0_i32_1 = arith.constant 0 : i32
    return %c0_i32, %arg0, %c0_i32_0 : i32, i32, i32
  }
  func.func @transform_4(%arg0: i32, %arg1: i32) -> (i32, i32, i32) {
    %c0_i32 = arith.constant 0 : i32
    %c0_i32_0 = arith.constant 0 : i32
    return %arg1, %arg0, %c0_i32 : i32, i32, i32
  }
  func.func @transform_5(%arg0: i32, %arg1: i32) -> (i32, i32, i32) {
    %c0_i32 = arith.constant 0 : i32
    %c0_i32_0 = arith.constant 0 : i32
    return %arg1, %arg0, %c0_i32 : i32, i32, i32
  }
  func.func @transform_6(%arg0: i32, %arg1: i32) -> (i32, i32, i32) {
    %c0_i32 = arith.constant 0 : i32
    %c0_i32_0 = arith.constant 0 : i32
    %c0_i32_1 = arith.constant 0 : i32
    return %c0_i32, %arg0, %c0_i32_0 : i32, i32, i32
  }
}

</mosaic_0001>

<bundles_post_ra>
// kernel: sac4dpl_forward.1
= control target key start
LH: loop header
LB: loop body
LE: loop exit
PB: predicated region body
PF: predicated region fallthrough
CT: control target
= control target key end

     0   :  { %12 = vsyncpa [#allocation4], 0  ;;  %s1844_s0 = inlined_call_operand.vmem [shape: f32[16,8,128], index: 0, kind: input, shape index: {}]   ;;  %s1845_s1 = inlined_call_operand.vmem [shape: f32[16,8,128], index: 1, kind: input, shape index: {}]   ;;  %s1846_s2 = inlined_call_operand.vmem [shape: f32[21,8,128], index: 2, kind: input, shape index: {}]   ;;  %s1847_s3 = inlined_call_operand.vmem [shape: f32[12,8,128], index: 3, kind: input, shape index: {}]   ;;  %s1848_s4 = inlined_call_operand.vmem [shape: f32[16,8,128], index: 4, kind: output, shape index: {0}]   ;;  %s1849_s5 = inlined_call_operand.vmem [shape: f32[16,8,128], index: 5, kind: output, shape index: {1}]   ;;  %s1850_s6 = inlined_call_operand.hbm [shape: f32[12,8,128], index: 6, kind: output, shape index: {2}]  }
   0x1   :  { %v1053_v0 = vld [vmem:[%s1847_s3] sm:$0xff]   ;;  %v1058_v1 = vld [vmem:[%s1847_s3 + $0x8] sm:$0xff]   ;;  %v1063_v2 = vld [vmem:[%s1847_s3 + $0x10] sm:$0xff]  }
   0x2   :  { %v1068_v3 = vld [vmem:[%s1847_s3 + $0x18] sm:$0xff]   ;;  %v1073_v4 = vld [vmem:[%s1847_s3 + $0x20] sm:$0xff]   ;;  %v1078_v5 = vld [vmem:[%s1847_s3 + $0x28] sm:$0xff]  }
   0x3   :  { %v1083_v6 = vld [vmem:[%s1847_s3 + $0x30] sm:$0xff]   ;;  %v1088_v7 = vld [vmem:[%s1847_s3 + $0x38] sm:$0xff]   ;;  %v1093_v8 = vld [vmem:[%s1847_s3 + $0x40] sm:$0xff]  }
   0x4   :  { %v1098_v9 = vld [vmem:[%s1847_s3 + $0x48] sm:$0xff]   ;;  %v1103_v10 = vld [vmem:[%s1847_s3 + $0x50] sm:$0xff]   ;;  %v1108_v11 = vld [vmem:[%s1847_s3 + $0x58] sm:$0xff]  }
   0x5   :  { %v1113_v12 = vld [vmem:[%s1846_s2] sm:$0xff]  ;;  %v1118_v13 = vld [vmem:[%s1846_s2 + $0x8] sm:$0xff]  ;;  %v712_v14 = vld [vmem:[%s1846_s2 + $0x10] sm:$0xff] }
   0x6   :  { %1899 = vst [vmem:[#allocation6_spill] sm:$0xff] %v1113_v12  ;;  %1900 = vst [vmem:[#allocation7_spill] sm:$0xff] %v1118_v13  ;;  %v1126_v15 = vld [vmem:[%s1846_s2 + $0x18] sm:$0xff]  ;;  %v1131_v16 = vld [vmem:[%s1846_s2 + $0x20] sm:$0xff]  ;;  %v119_v17 = vsub.f32 1.0, %v1118_v13  ;;  %v1154_v22 = vmul.f32 %v712_v14, %v712_v14 }
   0x7   :  { %1901 = vst [vmem:[#allocation8_spill] sm:$0xff] %v1126_v15  ;;  %1902 = vst [vmem:[#allocation9_spill] sm:$0xff] %v1131_v16  ;;  %v1137_v18 = vld [vmem:[%s1846_s2 + $0x28] sm:$0xff]  ;;  %v1142_v19 = vld [vmem:[%s1846_s2 + $0x30] sm:$0xff]  ;;  %858 = vrcp.f32 %v1126_v15  ;;  %v1152_v21 = vadd.f32 %v1131_v16, %v1126_v15 }
   0x8   :  { %v1147_v20 = vld [vmem:[%s1846_s2 + $0x38] sm:$0xff]  ;;  %1905 = vst [vmem:[#allocation12_spill] sm:$0xff] %v1154_v22  ;;  %v718_v23 = vld [vmem:[%s1846_s2 + $0x40] sm:$0xff]  ;;  %v1162_v24 = vld [vmem:[%s1846_s2 + $0x48] sm:$0xff]  ;;  %860 = vrcp.f32 %v1137_v18  ;;  %v99_v26 = vadd.f32 %v1137_v18, %v1126_v15  ;;  %v1192_v31 = vsub.f32 %v119_v17, %v712_v14 }
   0x9   :  { %1903 = vst [vmem:[#allocation10_spill] sm:$0xff] %v1147_v20  ;;  %1904 = vst [vmem:[#allocation11_spill] sm:$0xff] %v1152_v21  ;;  %v1167_v25 = vld [vmem:[%s1846_s2 + $0x50] sm:$0xff]  ;;  %v1174_v27 = vadd.f32 %v1147_v20, %v1142_v19  ;;  %v1179_v28 = vld [vmem:[%s1846_s2 + $0x58] sm:$0xff]  ;;  %862 = vrcp.f32 %v1131_v16  ;;  %v114_v62 = vmul.f32 2.0, %v1147_v20 }
   0xa   :  { %1906 = vst [vmem:[#allocation13_spill] sm:$0xff] %v1167_v25  ;;  %v1184_v29 = vld [vmem:[%s1846_s2 + $0x60] sm:$0xff]  ;;  %v1189_v30 = vld [vmem:[%s1846_s2 + $0x68] sm:$0xff]  ;;  %1908 = vst [vmem:[#allocation15_spill] sm:$0xff] %v1192_v31  ;;  %864 = vrcp.f32 %v1152_v21  ;;  %v122_v45 = vmul.f32 1000.0, %v1192_v31 }
   0xb   :  { %1907 = vst [vmem:[#allocation14_spill] sm:$0xff] %v1189_v30  ;;  %v1197_v32 = vld [vmem:[%s1846_s2 + $0x70] sm:$0xff]  ;;  %v1202_v33 = vld [vmem:[%s1846_s2 + $0x78] sm:$0xff]  ;;  %v1207_v34 = vld [vmem:[%s1846_s2 + $0x80] sm:$0xff]  ;;  %v1212_v35 = vadd.f32 %v1137_v18, %v1174_v27  ;;  %v1215_v36 = vmul.f32 %v718_v23, %v1174_v27  ;;  %866 = vrcp.f32 %v99_v26 }
   0xc   :  { %1909 = vst [vmem:[#allocation16_spill] sm:$0xff] %v1197_v32  ;;  %1910 = vst [vmem:[#allocation17_spill] sm:$0xff] %v1202_v33  ;;  %v1220_v37 = vld [vmem:[%s1846_s2 + $0x88] sm:$0xff]  ;;  %v1225_v38 = vld [vmem:[%s1846_s2 + $0x90] sm:$0xff]  ;;  %v106_v40 = vmul.f32 %v1197_v32, %v1142_v19  ;;  %v107_v41 = vmul.f32 %v1202_v33, %v1147_v20  ;;  %v124_v46 = vsub.f32 1.0, %v1207_v34 }
   0xd   :  { %1911 = vst [vmem:[#allocation18_spill] sm:$0xff] %v1207_v34  ;;  %1912 = vst [vmem:[#allocation19_spill] sm:$0xff] %v1215_v36  ;;  %v729_v39 = vld [vmem:[%s1846_s2 + $0x98] sm:$0xff]  ;;  %v730_v43 = vld [vmem:[%s1846_s2 + $0xa0] sm:$0xff]  ;;  %868 = vrcp.f32 %v1212_v35  ;;  %v110_v44 = vsub.f32 %v1174_v27, %v1215_v36  ;;  %v126_v48 = vsub.f32 1.0, %v1220_v37  ;;  %v128_v49 = vsub.f32 1.0, %v1225_v38 }
   0xe   :  { %1913 = vst [vmem:[#allocation20_spill] sm:$0xff] %v1220_v37  ;;  %1914 = vst [vmem:[#allocation21_spill] sm:$0xff] %v1225_v38  ;;  %v1243_v47 = vadd.f32 %v107_v41, %v106_v40  ;;  %870 = vrcp.f32 %v1174_v27  ;;  %v1249_v51 = vmul.f32 %v124_v46, %v122_v45  ;;  %v130_v52 = vmul.f32 24.0, %v729_v39  ;;  %s1316_s2 = smov 0  }
   0xf   :  { %v111_v50 = vadd.f32 %v1137_v18, %v110_v44  ;;  %v131_v53 = vsub.f32 1.0, %v730_v43  ;;  %v1251_v54 = vmul.f32 %v126_v48, %v122_v45  ;;  %v1253_v55 = vmul.f32 %v128_v49, %v122_v45 }
  0x10   :  { %1915 = vst [vmem:[#allocation22_spill] sm:$0xff] %v1249_v51  ;;  %v135_v17 = vsub.f32 0.0, %v130_v52  ;;  %v144_v41 = vmul.f32 %v730_v43, %v130_v52 }
  0x11   :  { %1916 = vst [vmem:[#allocation23_spill] sm:$0xff] %v1251_v54  ;;  %1917 = vst [vmem:[#allocation24_spill] sm:$0xff] %v1253_v55  ;;  %872 = vrcp.f32 %v111_v50  ;;  %v132_v56 = vmul.f32 %v131_v53, %v130_v52  ;;  %v1255_v57 = vpop.eup %858 }
  0x12   :  { %1918 = vst [vmem:[#allocation25_spill] sm:$0xff] %v1255_v57  ;;  %v1257_v58 = vpop.eup %860  ;;  %v136_v40 = vmul.f32 %v730_v43, %v135_v17  ;;  %v145_v50 = vadd.f32 12.0, %v144_v41 }
  0x13   :  { %v133_v59 = vadd.f32 12.0, %v132_v56  ;;  %v1259_v60 = vpop.eup %862  ;;  %v731_v49 = vadd.f32 -12.0, %v132_v56 }
  0x14   :  { %1919 = vst [vmem:[#allocation26_spill] sm:$0xff] %v1259_v60  ;;  %v1261_v61 = vpop.eup %864  ;;  %v137_v48 = vadd.f32 12.0, %v136_v40 }
  0x15   :  { %1920 = vst [vmem:[#allocation27_spill] sm:$0xff] %v1261_v61  ;;  %v134_v63 = vmax.f32 %v133_v59, 0.0  ;;  %v1264_v14 = vpop.eup %866 }
  0x16   :  { %1921 = vst [vmem:[#allocation28_spill] sm:$0xff] %v1264_v14 }
  0x17   :  { %v1266_v23 = vpop.eup %868  ;;  %874 = vrcp.f32 %v134_v63 }
  0x18   :  { %1922 = vst [vmem:[#allocation29_spill] sm:$0xff] %v1266_v23  ;;  %v871_v26 = vpop.eup %870 }
  0x19   :  { %v116_v39 = vmul.f32 %v871_v26, %v114_v62 }
  0x1b   :  { %v1268_v44 = vpop.eup %872  ;;  %v117_v45 = vmax.f32 %v116_v39, 0.0 }
  0x1c   :  { %1923 = vst [vmem:[#allocation30_spill] sm:$0xff] %v1268_v44 }
  0x1d   :  { %v1270_v46 = vmin.f32 %v117_v45, 1.0 }
  0x1f   :  { %1924 = vst [vmem:[#allocation31_spill] sm:$0xff] %v1270_v46 }
  0x21   :  { %v875_v53 = vpop.eup %874 }
  0x22   :  { %v1272_v59 = vmul.f32 %v875_v53, %v137_v48  ;;  %v1274_v42 = vmul.f32 %v875_v53, %v731_v49  ;;  %v1276_v54 = vmul.f32 %v875_v53, %v145_v50 }
  0x24   :  { %1925 = vst [vmem:[#allocation32_spill] sm:$0xff] %v1272_v59  ;;  %1926 = vst [vmem:[#allocation33_spill] sm:$0xff] %v1274_v42 }
  0x25   :  { %1927 = vst [vmem:[#allocation34_spill] sm:$0xff] %v1276_v54 }
  0x26 LB: > { %v1928_v61 = vld [vmem:[#allocation27_spill] sm:$0xff]  ;;  %v1929_v60 = vld [vmem:[#allocation26_spill] sm:$0xff]  ;;  %v1930_v57 = vld [vmem:[#allocation25_spill] sm:$0xff]  ;;  %1942 = vst [vmem:[#allocation35_spill] sm:$0xff] %v962_v11  ;;  %s1358_s13 = sshll.u32 %s1010_s2, 4  ;;  %s732_s17 = sshll.u32 %s1010_s2, 1  ;;  %v962_v11 = vphi %v1108_v11, %v1993_v11   ;;  %s1010_s2 = sphi %s1316_s2, %s176_s2   ;;  %v1006_v0 = vphi %v1053_v0, %v2004_v0   ;;  %v1002_v1 = vphi %v1058_v1, %v2003_v1   ;;  %v998_v2 = vphi %v1063_v2, %v2002_v2   ;;  %v994_v3 = vphi %v1068_v3, %v2001_v3   ;;  %v990_v4 = vphi %v1073_v4, %v2000_v4   ;;  %v986_v5 = vphi %v1078_v5, %v1999_v5   ;;  %v982_v6 = vphi %v1083_v6, %v1998_v6   ;;  %v978_v7 = vphi %v1088_v7, %v1997_v7   ;;  %v974_v8 = vphi %v1093_v8, %v1996_v8   ;;  %v970_v9 = vphi %v1098_v9, %v1995_v9   ;;  %v966_v10 = vphi %v1103_v10, %v1994_v10  }
  0x27   : > { %v1931_v51 = vld [vmem:[#allocation22_spill] sm:$0xff]  ;;  %v1933_v31 = vld [vmem:[#allocation15_spill] sm:$0xff]  ;;  %v1935_v22 = vld [vmem:[#allocation12_spill] sm:$0xff]  ;;  %1943 = vst [vmem:[#allocation36_spill] sm:$0xff] %v966_v10  ;;  %s194_s16 = scalar_lea.vmem %s1845_s1, %s1358_s13  ;;  %v205_v39 = vmul.f32 %v1006_v0, %v1930_v57  ;;  %v229_v40 = vmul.f32 %v998_v2, %v1930_v57  ;;  %s1373_s20 = scalar_lea.vmem %s1844_s0, %s1358_s13 }
  0x28   : > { %v1932_v34 = vld [vmem:[#allocation18_spill] sm:$0xff]  ;;  %v1936_v21 = vld [vmem:[#allocation11_spill] sm:$0xff]  ;;  %v1937_v16 = vld [vmem:[#allocation9_spill] sm:$0xff]  ;;  %1944 = vst [vmem:[#allocation37_spill] sm:$0xff] %v970_v9  ;;  %p1378_p0 = scmp.lt.s32.totalorder %s732_s17, 10  ;;  %s1439_s25 = scalar_lea.vmem %s1849_s5, %s1358_s13 }
  0x29   : > { %v1934_v30 = vld [vmem:[#allocation14_spill] sm:$0xff]  ;;  %v1938_v15 = vld [vmem:[#allocation8_spill] sm:$0xff]  ;;  %v1939_v13 = vld [vmem:[#allocation7_spill] sm:$0xff]  ;;  %1945 = vst [vmem:[#allocation38_spill] sm:$0xff] %v974_v8  ;;  %s388_s26 = sadd.s32 1, %s732_s17  ;;  %s1690_s29 = scalar_lea.vmem %s1848_s4, %s1358_s13 }
  0x2a   : > { %v1940_v14 = vld [vmem:[#allocation28_spill] sm:$0xff]  ;;  %v1941_v12 = vld [vmem:[#allocation6_spill] sm:$0xff]  ;;  %1946 = vst [vmem:[#allocation39_spill] sm:$0xff] %v990_v4  ;;  %v739_v56 = vld [vmem:[%s194_s16 + $0x8] sm:$0xff]  ;;  %s373_s22 = scalar_select %p1378_p0, 1, 0 }
  0x2b   : > { %v195_v43 = vld [vmem:[%s194_s16] sm:$0xff]  ;;  %v396_v41 = vand.u32 2147483647, %v739_v56  ;;  %vm395_vm3 = vcmp.ne.f32.partialorder %v739_v56, %v739_v56  ;;  %v236_v63 = vmul.f32 %v990_v4, %v1940_v14  ;;  %v1950_v25 = vld [vmem:[#allocation13_spill] sm:$0xff]  ;;  %p571_p1 = scmp.lt.s32.totalorder %s388_s26, 10  ;;  %s176_s2 = sadd.s32 1, %s1010_s2  }
  0x2c   : > { %vm196_vm0 = vcmp.ne.f32.partialorder %v195_v43, %v195_v43  ;;  %v197_v52 = vand.u32 2147483647, %v195_v43  ;;  %v192_v48 = vld [vmem:[%s1373_s20] sm:$0xff]  ;;  %v1404_v37 = vstv %s373_s22  ;;  %v1951_v23 = vld [vmem:[#allocation29_spill] sm:$0xff]  ;;  %p1788_p2 = scmp.ge.s32.totalorder %s176_s2, 8  }
  0x2d   : > { %vm397_vm4 = vcmp.eq.f32.partialorder %v396_v41, inf  ;;  %v248_v41 = vadd.f32 %v994_v3, %v998_v2  ;;  %vm375_vm6 = vcmp.eq.s32.totalorder %v1404_v37, 1  ;;  %s572_s27 = scalar_select %p571_p1, 1, 0 }
  0x2e   : > { %vm198_vm1 = vcmp.eq.f32.partialorder %v197_v52, inf  ;;  %vm1387_vm5 = vmor %vm395_vm3, %vm397_vm4  ;;  %s1012_s7 = smov (%p1788_p2), [#allocation3]  }
  0x2f   : > { %vm199_vm2 = vmor %vm196_vm0, %vm198_vm1  ;;  %v399_v11 = vsel %vm1387_vm5, 0.0, %v739_v56  ;;  %s631_s8 = sshll.u32 (%p1788_p2), %s1012_s7, 4  ;;  %s632_s8 = int_to_ptr.vmem [resolvable:$true] %s631_s8 }
  0x30   : > { %v200_v17 = vsel %vm199_vm2, 0.0, %v195_v43  ;;  %v209_v43 = vmul.f32 %v1002_v1, %v1940_v14  ;;  %s884_s0 = scalar_lea.vmem (%p1788_p2), %s632_s8, 1536  ;;  %p889_p4 = scmp.lt.s32.totalorder (%p1788_p2), %s632_s8, %s632_s8 }
  0x31   : > { %v201_v26 = vmax.f32 %v200_v17, 0.0  ;;  %v400_v17 = vmax.f32 %v399_v11, 0.0  ;;  %p885_p3 = scmp.ne.s32.totalorder (%p1788_p2), %s632_s8, %s884_s0  ;;  %p890_p5 = scmp.lt.s32.totalorder (%p1788_p2), %s884_s0, %s884_s0 }
  0x33   : > { %v202_v45 = vmul.f32 %v201_v26, %v1941_v12  ;;  %v193_v26 = vmax.f32 %v192_v48, 0.0  ;;  %p891_p6 = por (%p1788_p2), %p890_p5, %p889_p4 }
  0x35   : > { %v206_v49 = vmul.f32 %v205_v39, %v202_v45  ;;  %v230_v50 = vmul.f32 %v229_v40, %v202_v45  ;;  %v204_v62 = vmul.f32 %v1939_v13, %v202_v45  ;;  %p892_p7 = pnand (%p1788_p2), %p891_p6, %p885_p3 }
  0x37   : > { %v207_v53 = vmin.f32 %v1006_v0, %v206_v49  ;;  %v231_v52 = vmin.f32 %v998_v2, %v230_v50 }
  0x39   : > { %v208_v39 = vsub.f32 %v202_v45, %v207_v53  ;;  %v212_v40 = vsub.f32 %v1006_v0, %v207_v53  ;;  %v232_v49 = vsub.f32 %v202_v45, %v231_v52  ;;  %v255_v50 = vsub.f32 %v998_v2, %v231_v52 }
  0x3a   : > { %v242_v44 = vadd.f32 %v207_v53, %v204_v62  ;;  %v249_v36 = vsub.f32 %v248_v41, %v231_v52 }
  0x3b   : > { %v210_v48 = vmul.f32 %v209_v43, %v208_v39  ;;  %v213_v42 = vsub.f32 %v1938_v15, %v212_v40  ;;  %v224_v59 = vadd.f32 %v212_v40, %v193_v26  ;;  %v233_v54 = vmin.f32 %v994_v3, %v232_v49 }
  0x3c   : > { %v256_v9 = vadd.f32 %v255_v50, %v193_v26 }
  0x3d   : > { %v211_v32 = vmax.f32 %v210_v48, 0.0  ;;  %v214_v55 = vsub.f32 %v193_v26, %v213_v42  ;;  %v225_v10 = vmin.f32 %v1938_v15, %v224_v59  ;;  %v234_v38 = vmax.f32 %v233_v54, 0.0 }
  0x3e   : > { %v257_v33 = vmin.f32 %v1938_v15, %v256_v9 }
  0x3f   : > { %v215_v56 = vmax.f32 %v214_v55, 0.0  ;;  %v216_v43 = vsub.f32 %v1002_v1, %v211_v32  ;;  %v226_v39 = vmax.f32 %v225_v10, 0.0  ;;  %v235_v40 = vsub.f32 %v232_v49, %v234_v38 }
  0x40   : > { %v243_v46 = vadd.f32 %v242_v44, %v211_v32  ;;  %v250_v20 = vsub.f32 %v249_v36, %v234_v38  ;;  %v1409_v62 = vmax.f32 %v257_v33, 0.0  ;;  %v1419_v55 = vmul.f32 %v400_v17, %v1941_v12 }
  0x41   : > { %v217_v53 = vmul.f32 %v1257_v58, %v216_v43  ;;  %v237_v42 = vmul.f32 %v236_v63, %v235_v40  ;;  %v1416_v54 = vsel %vm375_vm6, %v226_v39, %v1006_v0  ;;  %v241_v36 = vmul.f32 %v1950_v25, %v202_v45 }
  0x42   : > { %v244_v9 = vadd.f32 %v243_v46, %v231_v52  ;;  %v251_v11 = vadd.f32 %v250_v20, %v193_v26  ;;  %v404_v10 = vmul.f32 %v1930_v57, %v1416_v54  ;;  %v1430_v52 = vadd.f32 %v982_v6, %v986_v5 }
  0x43   : > { %v218_v32 = vmul.f32 %v217_v53, %v215_v56  ;;  %v238_v33 = vmax.f32 %v237_v42, 0.0 }
  0x44   : > { %v245_v44 = vadd.f32 %v244_v9, %v234_v38  ;;  %v259_v59 = vsub.f32 %v251_v11, %v1409_v62  ;;  %v405_v0 = vmul.f32 %v404_v10, %v1419_v55  ;;  %v252_v46 = vsub.f32 %v251_v11, %v1936_v21  ;;  %v736_v38 = vld [vmem:[%s1373_s20 + $0x8] sm:$0xff] }
  0x45   : > { %v219_v63 = vmax.f32 %v218_v32, 0.0  ;;  %v239_v20 = vsub.f32 %v990_v4, %v238_v33  ;;  %v203_v9 = vmul.f32 %v1939_v13, %v193_v26  ;;  %v347_v10 = vmul.f32 %v974_v8, %v1932_v34 }
  0x46   : > { %v246_v41 = vadd.f32 %v245_v44, %v238_v33  ;;  %v260_v49 = vmin.f32 %v1937_v16, %v259_v59  ;;  %v406_v45 = vmin.f32 %v1416_v54, %v405_v0  ;;  %v253_v53 = vmax.f32 %v252_v46, 0.0 }
  0x47   : > { %v220_v50 = vsub.f32 %v215_v56, %v219_v63  ;;  %v1433_v48 = vmax.f32 %v239_v20, 0.0  ;;  %v1453_v32 = vmax.f32 %v736_v38, 0.0  ;;  %v403_v44 = vmul.f32 %v1939_v13, %v1419_v55 }
  0x48   : > { %v247_v17 = vadd.f32 %v246_v41, %v241_v36  ;;  %v261_v39 = vmax.f32 %v260_v49, 0.0  ;;  %v411_v56 = vsub.f32 %v1416_v54, %v406_v45  ;;  %v254_v49 = vmul.f32 %v253_v53, %v1933_v31 }
  0x49   : > { %v221_v40 = vadd.f32 %v220_v50, %v216_v43  ;;  %v1445_v42 = vadd.f32 %v1430_v52, %v1433_v48 }
  0x4a   : > { %v262_v11 = vmul.f32 %v1934_v30, %v261_v39  ;;  %368 = vst [vmem:[%s1439_s25] sm:$0xff] %v247_v17  ;;  %v412_v0 = vsub.f32 %v1938_v15, %v411_v56  ;;  %v1464_v20 = vadd.f32 %v411_v56, %v1453_v32 }
  0x4b   : > { %v222_v33 = vsub.f32 %v221_v40, %v1137_v18  ;;  %v227_v43 = vmin.f32 %v1137_v18, %v221_v40  ;;  %v267_v36 = vmul.f32 %v1951_v23, %v1445_v42  ;;  %v407_v40 = vsub.f32 %v1419_v55, %v406_v45 }
  0x4c   : > { %v263_v59 = vsub.f32 %v261_v39, %v262_v11  ;;  %v348_v26 = vmul.f32 %v262_v11, %v1931_v51  ;;  %v413_v12 = vsub.f32 %v1453_v32, %v412_v0  ;;  %v313_v11 = vmul.f32 %v1930_v57, %v1409_v62 }
  0x4d   : > { %v223_v46 = vmax.f32 %v222_v33, 0.0  ;;  %v228_v41 = vmax.f32 %v227_v43, 0.0  ;;  %v268_v50 = vsub.f32 1.0, %v267_v36 }
  0x4e   : > { %v264_v38 = vmax.f32 %v263_v59, 0.0  ;;  %v1467_v17 = vadd.f32 %v348_v26, %v347_v10 }
  0x4f   : > { %v1471_v39 = vmax.f32 %v268_v50, 0.0  ;;  %v341_v23 = vadd.f32 %v223_v46, %v219_v63  ;;  %v1478_v56 = vsel %vm375_vm6, %v228_v41, %v1002_v1  ;;  %v1953_v63 = vmax.f32 %v1933_v31, 0.0 }
  0x50   : > { %1952 = vst [vmem:[#allocation40_spill] sm:$0xff] %v1467_v17  ;;  %v314_v53 = vadd.f32 %v264_v38, %v1409_v62  ;;  %v1879_v10 = vmax.f32 %v1467_v17, 0.0  ;;  %v408_v33 = vmul.f32 %v1940_v14, %v1478_v56  ;;  %v1486_v36 = vmul.f32 %v1929_v60, %v264_v38 }
  0x51   : > { %v271_v43 = vmax.f32 %v1471_v39, 1e-38  ;;  %v342_v59 = vmul.f32 %v341_v23, %v1935_v22  ;;  %v344_v26 = vmul.f32 %v254_v49, %v1953_v63  ;;  %v441_v41 = vadd.f32 %v406_v45, %v403_v44 }
  0x52   : > { %v315_v1 = vmul.f32 %v1928_v61, %v314_v53  ;;  %v1497_v0 = vsel %vm375_vm6, %v1879_v10, %v974_v8  ;;  %v409_v46 = vmul.f32 %v408_v33, %v407_v40  ;;  %vm316_vm7 = vcmp.lt.f32.partialorder %v313_v11, %v1486_v36 }
  0x53   : > { %876 = vlog2.f32 %v271_v43  ;;  %v343_v50 = vadd.f32 %v342_v59, %v203_v9  ;;  %v414_v53 = vmax.f32 %v413_v12, 0.0  ;;  %vm270_vm8 = vcmp.gt.f32.partialorder %v1471_v39, 0.0 }
  0x54   : > { %v317_v23 = vmul.f32 %v1938_v15, %v315_v1  ;;  %v319_v25 = vmul.f32 %v1937_v16, %v315_v1  ;;  %v410_v49 = vmax.f32 %v409_v46, 0.0  ;;  %v283_v39 = vsub.f32 %v1212_v35, %v1445_v42 }
  0x55   : > { %v345_v63 = vadd.f32 %v344_v26, %v343_v50 }
  0x56   : > { %v318_v14 = vsel %vm316_vm7, %v317_v23, %v1409_v62  ;;  %v320_v4 = vsel %vm316_vm7, %v319_v25, %v264_v38  ;;  %v415_v17 = vsub.f32 %v1478_v56, %v410_v49  ;;  %v442_v10 = vadd.f32 %v441_v41, %v410_v49 }
  0x57   : > { %v1504_v8 = vmul.f32 1000.0, %v345_v63  ;;  %v1509_v45 = vsel %vm375_vm6, %v318_v14, %v998_v2  ;;  %v1514_v9 = vsel %vm375_vm6, %v320_v4, %v994_v3 }
  0x58   : > { %v416_v12 = vmul.f32 %v1257_v58, %v415_v17  ;;  %v428_v25 = vmul.f32 %v1930_v57, %v1509_v45  ;;  %v447_v62 = vadd.f32 %v1514_v9, %v1509_v45 }
  0x59   : > { %v1525_v44 = vsel %vm375_vm6, %v1504_v8, %v978_v7 }
  0x5a   : > { %v417_v2 = vmul.f32 %v416_v12, %v414_v53  ;;  %v429_v14 = vmul.f32 %v428_v25, %v1419_v55 }
  0x5c   : > { %v418_v38 = vmax.f32 %v417_v2, 0.0  ;;  %v430_v3 = vmin.f32 %v1509_v45, %v429_v14 }
  0x5d   : > { %v877_v4 = vpop.eup %876 }
  0x5e   : > { %v273_v40 = vmul.f32 0.6931472, %v877_v4  ;;  %v419_v11 = vsub.f32 %v414_v53, %v418_v38  ;;  %v1530_v33 = vsub.f32 %v1419_v55, %v430_v3  ;;  %v443_v43 = vadd.f32 %v442_v10, %v430_v3 }
  0x5f   : > { %v448_v59 = vsub.f32 %v447_v62, %v430_v3  ;;  %v454_v26 = vsub.f32 %v1509_v45, %v430_v3 }
  0x60   : > { %v274_v1 = vmul.f32 %v1184_v29, %v273_v40  ;;  %v1534_v46 = vadd.f32 %v419_v11, %v415_v17  ;;  %v432_v41 = vmin.f32 %v1514_v9, %v1530_v33 }
  0x61   : > { %v455_v50 = vadd.f32 %v454_v26, %v1453_v32 }
  0x62   : > { %v275_v23 = vmul.f32 1.442695, %v274_v1  ;;  %v1539_v49 = vmax.f32 %v432_v41, 0.0  ;;  %v421_v14 = vsub.f32 %v1534_v46, %v1137_v18 }
  0x63   : > { %v456_v63 = vmin.f32 %v1938_v15, %v455_v50 }
  0x64   : > { %878 = vpow2.f32 %v275_v23  ;;  %v1545_v53 = vadd.f32 %v443_v43, %v1539_v49  ;;  %v449_v17 = vsub.f32 %v448_v59, %v1539_v49  ;;  %v422_v26 = vmax.f32 %v421_v14, 0.0 }
  0x65   : > { %v457_v12 = vmax.f32 %v456_v63, 0.0  ;;  %v287_v14 = vsub.f32 %v1137_v18, %v1433_v48 }
  0x66   : > { %v450_v25 = vadd.f32 %v449_v17, %v1453_v32  ;;  %v402_v17 = vmul.f32 %v1939_v13, %v1453_v32  ;;  %v1954_v32 = vmax.f32 %v1933_v31, 0.0  ;;  %v1969_v13 = vld [vmem:[#allocation19_spill] sm:$0xff] }
  0x68   : > { %v458_v62 = vsub.f32 %v450_v25, %v457_v12  ;;  %v451_v3 = vsub.f32 %v450_v25, %v1936_v21  ;;  %v540_v25 = vadd.f32 %v422_v26, %v418_v38  ;;  %v546_v26 = vmul.f32 %v1932_v34, %v1497_v0 }
  0x6a   : > { %v459_v2 = vmin.f32 %v1937_v16, %v458_v62  ;;  %v452_v1 = vmax.f32 %v451_v3, 0.0 }
  0x6c   : > { %v460_v4 = vmax.f32 %v459_v2, 0.0  ;;  %v453_v62 = vmul.f32 %v452_v1, %v1933_v31 }
  0x6e   : > { %v879_v40 = vpop.eup %878  ;;  %v461_v43 = vmul.f32 %v1934_v30, %v460_v4  ;;  %v543_v38 = vmul.f32 %v453_v62, %v1954_v32  ;;  %v1972_v30 = vld [vmem:[#allocation40_spill] sm:$0xff] }
  0x6f   : > { %v277_v11 = vsel %vm270_vm8, %v879_v40, 0.0  ;;  %v541_v40 = vmul.f32 %v540_v25, %v1935_v22  ;;  %v1973_v31 = vmax.f32 %v1972_v30, 0.0 }
  0x70   : > { %v278_v59 = vmul.f32 %v1179_v28, %v277_v11  ;;  %v462_v41 = vsub.f32 %v460_v4, %v461_v43  ;;  %v512_v11 = vmul.f32 %v1930_v57, %v457_v12 }
  0x71   : > { %v359_v34 = vadd.f32 %v1973_v31, %v1504_v8 }
  0x72   : > { %v279_v50 = vadd.f32 1.0, %v278_v59  ;;  %v463_v23 = vmax.f32 %v462_v41, 0.0  ;;  %v542_v59 = vadd.f32 %v541_v40, %v402_v17 }
  0x74   : > { %v280_v63 = vmul.f32 %v279_v50, %v1243_v47  ;;  %v1567_v3 = vmul.f32 %v1929_v60, %v463_v23  ;;  %v513_v42 = vadd.f32 %v463_v23, %v457_v12  ;;  %v286_v50 = vsub.f32 %v1174_v27, %v1430_v52 }
  0x76   : > { %v282_v2 = vmul.f32 %v1486_v36, %v280_v63  ;;  %v547_v36 = vmul.f32 %v461_v43, %v1931_v51  ;;  %v514_v41 = vmul.f32 %v1928_v61, %v513_v42  ;;  %vm515_vm9 = vcmp.lt.f32.partialorder %v512_v11, %v1567_v3 }
  0x77   : > { %v544_v63 = vadd.f32 %v543_v38, %v542_v59  ;;  %v537_v11 = vadd.f32 %v1497_v0, %v1525_v44  ;;  %v424_v38 = vmin.f32 %v1938_v15, %v1464_v20 }
  0x78   : > { %v284_v4 = vmin.f32 %v282_v2, %v283_v39  ;;  %v548_v39 = vadd.f32 %v547_v36, %v546_v26  ;;  %v516_v62 = vmul.f32 %v1938_v15, %v514_v41  ;;  %v518_v2 = vmul.f32 %v1937_v16, %v514_v41  ;;  %v1956_v41 = vld [vmem:[#allocation31_spill] sm:$0xff] }
  0x79   : > { %v545_v40 = vmul.f32 1000.0, %v544_v63  ;;  %v426_v26 = vmin.f32 %v1137_v18, %v1534_v46 }
  0x7a   : > { %v285_v1 = vmax.f32 %v284_v4, 0.0  ;;  %v549_v43 = vmax.f32 %v548_v39, 0.0  ;;  %v517_v32 = vsel %vm515_vm9, %v516_v62, %v457_v12  ;;  %v519_v42 = vsel %vm515_vm9, %v518_v2, %v463_v23  ;;  %v1955_v12 = vld [vmem:[#allocation10_spill] sm:$0xff] }
  0x7b   : > { %v295_v23 = vsub.f32 %v1955_v12, %v982_v6  ;;  %v425_v39 = vmax.f32 %v424_v38, 0.0  ;;  %v573_v62 = vstv %s572_s27 }
  0x7c   : > { %v288_v17 = vsub.f32 %v285_v1, %v287_v14  ;;  %v289_v25 = vmul.f32 %v1162_v24, %v285_v1  ;;  %v1584_v10 = vadd.f32 %v549_v43, %v545_v40  ;;  %v296_v14 = vsub.f32 %v1142_v19, %v986_v5 }
  0x7d   : > { %vm1597_vm10 = vcmp.eq.s32.totalorder %v573_v62, 1  ;;  %v1967_v62 = vld [vmem:[#allocation20_spill] sm:$0xff] }
  0x7e   : > { %v290_v4 = vmax.f32 %v288_v17, %v289_v25  ;;  %v427_v17 = vmax.f32 %v426_v26, 0.0  ;;  %v1604_v46 = vsel %vm1597_vm10, %v425_v39, %v1416_v54   ;;  %v1619_v38 = vsel %vm1597_vm10, %v519_v42, %v1514_v9   ;;  %v1962_v9 = vld [vmem:[#allocation38_spill] sm:$0xff]  ;;  %v1965_v39 = vld [vmem:[#allocation24_spill] sm:$0xff] }
  0x7f   : > { %1959 = vst [vmem:[#allocation41_spill] sm:$0xff] %v1604_v46  ;;  %v1624_v54 = vsel %vm1597_vm10, %v545_v40, %v1525_v44   ;;  %v338_v42 = vadd.f32 %v1962_v9, %v978_v7  ;;  %v1964_v44 = vld [vmem:[#allocation36_spill] sm:$0xff]  ;;  %v1970_v7 = vld [vmem:[#allocation23_spill] sm:$0xff]  ;;  %597 = vst [vmem:[#allocation3 + $0x18] sm:$0xff] (%p1788_p2), %v1619_v38 }
  0x80   : > { %v291_v52 = vmin.f32 %v286_v50, %v290_v4  ;;  %v1971_v16 = vmov %v1970_v7  ;;  %609 = vst [vmem:[#allocation3 + $0x38] sm:$0xff] (%p1788_p2), %v1624_v54 }
  0x82   : > { %v292_v59 = vmax.f32 %v291_v52, 0.0 }
  0x84   : > { %v297_v36 = vsub.f32 %v292_v59, %v296_v14  ;;  %v298_v63 = vmul.f32 %v292_v59, %v1956_v41  ;;  %v293_v20 = vsub.f32 %v285_v1, %v292_v59  ;;  %v1609_v1 = vsel %vm1597_vm10, %v427_v17, %v1478_v56  }
  0x85   : > { %v1960_v52 = vmov %v1609_v1  ;;  %v1614_v14 = vsel %vm1597_vm10, %v517_v32, %v1509_v45   ;;  %v1629_v56 = vsel %vm1597_vm10, %v549_v43, %v1497_v0   ;;  %v1966_v43 = vld [vmem:[#allocation16_spill] sm:$0xff] }
  0x86   : > { %v299_v50 = vmax.f32 %v297_v36, %v298_v63  ;;  %v294_v45 = vmax.f32 %v293_v20, 0.0  ;;  %v1968_v20 = vld [vmem:[#allocation37_spill] sm:$0xff]  ;;  %v2002_v2 = vmov %v1614_v14  ;;  %591 = vst [vmem:[#allocation3 + $0x8] sm:$0xff] (%p1788_p2), %v1960_v52  ;;  %594 = vst [vmem:[#allocation3 + $0x10] sm:$0xff] (%p1788_p2), %v1614_v14 }
  0x87   :  { %612 = vst [vmem:[#allocation3 + $0x40] sm:$0xff] (%p1788_p2), %v1629_v56 }
  0x88   : > { %v300_v25 = vmin.f32 %v295_v23, %v299_v50  ;;  %v1961_v23 = vld [vmem:[#allocation17_spill] sm:$0xff]  ;;  %v304_v0 = vadd.f32 %v294_v45, %v1433_v48  ;;  %v1974_v45 = vld [vmem:[#allocation30_spill] sm:$0xff] }
  0x89   : > { %v1963_v50 = vld [vmem:[#allocation21_spill] sm:$0xff] }
  0x8a   : > { %v301_v4 = vmax.f32 %v300_v25, 0.0  ;;  %v355_v40 = vmul.f32 %v1964_v44, %v1963_v50  ;;  %v326_v57 = vmul.f32 %v1257_v58, %v304_v0 }
  0x8c   : > { %v302_v1 = vsub.f32 %v292_v59, %v301_v4  ;;  %v306_v26 = vadd.f32 %v982_v6, %v301_v4  ;;  %v351_v4 = vmul.f32 %v1968_v20, %v1967_v62 }
  0x8e   : > { %v303_v32 = vmax.f32 %v302_v1, 0.0  ;;  %v310_v36 = vmul.f32 %v1961_v23, %v306_v26  ;;  %v339_v1 = vadd.f32 %v1968_v20, %v338_v42 }
  0x90   : > { %v305_v63 = vadd.f32 %v986_v5, %v303_v32  ;;  %v356_v17 = vmul.f32 %v310_v36, %v1965_v39  ;;  %v340_v48 = vadd.f32 %v1964_v44, %v339_v1  ;;  %v1982_v1 = vld [vmem:[#allocation35_spill] sm:$0xff] }
  0x92   : > { %v307_v59 = vmul.f32 %v1966_v43, %v305_v63  ;;  %v321_v25 = vadd.f32 %v306_v26, %v305_v63  ;;  %v357_v32 = vadd.f32 %v356_v17, %v355_v40 }
  0x94   : > { %v322_v15 = vsub.f32 %v321_v25, %v1969_v13  ;;  %v352_v9 = vmul.f32 %v307_v59, %v1970_v7  ;;  %v358_v61 = vmax.f32 %v357_v32, 0.0  ;;  %v1983_v32 = vld [vmem:[#allocation39_spill] sm:$0xff] }
  0x96   : > { %v323_v21 = vadd.f32 %v322_v15, %v304_v0  ;;  %v353_v22 = vadd.f32 %v352_v9, %v351_v4  ;;  %v1975_v15 = vld [vmem:[#allocation34_spill] sm:$0xff]  ;;  %v1667_v31 = vsel %vm375_vm6, %v358_v61, %v1964_v44 }
  0x97   : > { %v362_v17 = vmul.f32 %v340_v48, %v1975_v15 }
  0x98   : > { %v324_v51 = vmul.f32 %v1974_v45, %v323_v21  ;;  %v354_v60 = vmax.f32 %v353_v22, 0.0 }
  0x9a   : > { %v325_v42 = vmax.f32 %v324_v51, 0.0  ;;  %v360_v46 = vadd.f32 %v359_v34, %v354_v60  ;;  %v1655_v40 = vsel %vm375_vm6, %v354_v60, %v1968_v20  ;;  %v308_v34 = vsub.f32 %v305_v63, %v307_v59  ;;  %v1980_v20 = vld [vmem:[#allocation33_spill] sm:$0xff]  ;;  %v1984_v59 = vld [vmem:[#allocation28_spill] sm:$0xff] }
  0x9b   : > { %v538_v30 = vadd.f32 %v537_v11, %v1655_v40  ;;  %v1981_v4 = vmax.f32 %v1980_v20, 0.0  ;;  %v1991_v37 = vmax.f32 %v1980_v20, 0.0 }
  0x9c   : > { %vm1659_vm11 = vcmp.lt.f32.partialorder %v326_v57, %v325_v42  ;;  %v328_v21 = vmul.f32 %v1137_v18, %v325_v42  ;;  %v361_v22 = vadd.f32 %v360_v46, %v358_v61  ;;  %v1978_v57 = vld [vmem:[#allocation32_spill] sm:$0xff]  ;;  %v311_v46 = vsub.f32 %v306_v26, %v310_v36 }
  0x9d   : > { %v1670_v51 = vadd.f32 %v538_v30, %v1667_v31  ;;  %v1979_v11 = vmax.f32 %v1978_v57, 0.0  ;;  %v365_v7 = vmul.f32 %v1982_v1, %v1981_v4  ;;  %v309_v42 = vmax.f32 %v308_v34, 0.0 }
  0x9e   : > { %v329_v60 = vsel %vm1659_vm11, %v328_v21, %v304_v0 }
  0x9f   : > { %v363_v25 = vmul.f32 %v361_v22, %v1979_v11  ;;  %v330_v9 = vsub.f32 %v329_v60, %v304_v0  ;;  %v1682_v61 = vsel %vm375_vm6, %v329_v60, %v1983_v32  ;;  %v1985_v0 = vsub.f32 %v1530_v33, %v1539_v49 }
  0xa0   : > { %v435_v48 = vmul.f32 %v1984_v59, %v1682_v61  ;;  %v312_v60 = vmax.f32 %v311_v46, 0.0  ;;  %v1987_v59 = vld [vmem:[#allocation29_spill] sm:$0xff] }
  0xa1   : > { %v364_v44 = vadd.f32 %v363_v25, %v362_v17  ;;  %v331_v30 = vsub.f32 %v305_v63, %v330_v9  ;;  %v334_v21 = vsub.f32 %v330_v9, %v305_v63  ;;  %v1986_v63 = vld [vmem:[#allocation13_spill] sm:$0xff] }
  0xa2   : > { %v436_v22 = vmul.f32 %v435_v48, %v1985_v0  ;;  %v440_v25 = vmul.f32 %v1986_v63, %v1419_v55 }
  0xa3   : > { %v1692_v36 = vadd.f32 %v365_v7, %v364_v44  ;;  %v332_v17 = vmax.f32 %v331_v30, 0.0  ;;  %v335_v11 = vmax.f32 %v334_v21, 0.0 }
  0xa4   : > { %v437_v34 = vmax.f32 %v436_v22, 0.0 }
  0xa5   : > { %370 = vst [vmem:[%s1690_s29] sm:$0xff] %v1692_v36  ;;  %v333_v4 = vsel %vm1659_vm11, %v332_v17, %v309_v42  ;;  %v336_v9 = vsub.f32 %v306_v26, %v335_v11 }
  0xa6   : > { %v1706_v7 = vsel %vm375_vm6, %v333_v4, %v986_v5  ;;  %v438_v33 = vsub.f32 %v1682_v61, %v437_v34  ;;  %v445_v49 = vadd.f32 %v1545_v53, %v437_v34 }
  0xa7   : > { %v337_v46 = vsel %vm1659_vm11, %v336_v9, %v312_v60 }
  0xa8   : > { %v1715_v55 = vsel %vm375_vm6, %v337_v46, %v982_v6  ;;  %v439_v32 = vmax.f32 %v438_v33, 0.0  ;;  %v446_v44 = vadd.f32 %v445_v49, %v440_v25 }
  0xa9   : > { %v464_v26 = vadd.f32 %v1715_v55, %v1706_v7 }
  0xaa   : > { %742 = vst [vmem:[%s1439_s25 + $0x8] sm:$0xff] %v446_v44  ;;  %v486_v9 = vsub.f32 %v1137_v18, %v439_v32 }
  0xab   : > { %v465_v5 = vadd.f32 %v464_v26, %v439_v32  ;;  %v485_v49 = vsub.f32 %v1174_v27, %v464_v26 }
  0xad   : > { %v466_v48 = vmul.f32 %v1987_v59, %v465_v5  ;;  %v482_v63 = vsub.f32 %v1212_v35, %v465_v5  ;;  %v494_v5 = vsub.f32 %v1955_v12, %v1715_v55 }
  0xaf   : > { %v467_v42 = vsub.f32 1.0, %v466_v48 }
  0xb1   : > { %v468_v30 = vmax.f32 %v467_v42, 0.0  ;;  %v495_v42 = vsub.f32 %v1142_v19, %v1706_v7 }
  0xb3   : > { %v470_v53 = vmax.f32 %v468_v30, 1e-38  ;;  %vm469_vm12 = vcmp.gt.f32.partialorder %v468_v30, 0.0 }
  0xb5   : > { %880 = vlog2.f32 %v470_v53 }
  0xbf   : > { %v881_v8 = vpop.eup %880 }
  0xc0   : > { %v472_v21 = vmul.f32 0.6931472, %v881_v8 }
  0xc2   : > { %v473_v0 = vmul.f32 %v1184_v29, %v472_v21 }
  0xc4   : > { %v474_v22 = vmul.f32 1.442695, %v473_v0 }
  0xc6   : > { %882 = vpow2.f32 %v474_v22 }
  0xd0   : > { %v883_v6 = vpop.eup %882 }
  0xd1   : > { %v476_v60 = vsel %vm469_vm12, %v883_v6, 0.0 }
  0xd2   : > { %v477_v17 = vmul.f32 %v1179_v28, %v476_v60 }
  0xd4   : > { %v478_v11 = vadd.f32 1.0, %v477_v17 }
  0xd6   : > { %v479_v34 = vmul.f32 %v478_v11, %v1243_v47 }
  0xd8   : > { %v481_v25 = vmul.f32 %v1567_v3, %v479_v34 }
  0xda   : > { %v483_v4 = vmin.f32 %v481_v25, %v482_v63  ;;  %v554_v63 = vmul.f32 %v1963_v50, %v1667_v31 }
  0xdc   : > { %v484_v33 = vmax.f32 %v483_v4, 0.0 }
  0xde   : > { %v487_v46 = vsub.f32 %v484_v33, %v486_v9  ;;  %v488_v44 = vmul.f32 %v1162_v24, %v484_v33 }
  0xe0   : > { %v489_v59 = vmax.f32 %v487_v46, %v488_v44 }
  0xe2   : > { %v490_v48 = vmin.f32 %v485_v49, %v489_v59 }
  0xe4   : > { %v491_v30 = vmax.f32 %v490_v48, 0.0 }
  0xe6   : > { %v492_v53 = vsub.f32 %v484_v33, %v491_v30  ;;  %v496_v3 = vsub.f32 %v491_v30, %v495_v42  ;;  %v497_v8 = vmul.f32 %v491_v30, %v1956_v41 }
  0xe8   : > { %v493_v21 = vmax.f32 %v492_v53, 0.0  ;;  %v498_v0 = vmax.f32 %v496_v3, %v497_v8 }
  0xea   : > { %v499_v22 = vmin.f32 %v494_v5, %v498_v0  ;;  %v503_v26 = vadd.f32 %v493_v21, %v439_v32  ;;  %v550_v32 = vmul.f32 %v1967_v62, %v1655_v40  ;;  %v387_v0 = vsel %vm375_vm6, %v1692_v36, %v1982_v1 }
  0xeb   : > { %v564_v1 = vmul.f32 %v387_v0, %v1991_v37 }
  0xec   : > { %v500_v6 = vmax.f32 %v499_v22, 0.0  ;;  %v525_v5 = vmul.f32 %v1257_v58, %v503_v26 }
  0xee   : > { %v501_v60 = vsub.f32 %v491_v30, %v500_v6  ;;  %v505_v17 = vadd.f32 %v500_v6, %v1715_v55 }
  0xf0   : > { %v502_v11 = vmax.f32 %v501_v60, 0.0  ;;  %v509_v34 = vmul.f32 %v1961_v23, %v505_v17 }
  0xf2   : > { %v504_v25 = vadd.f32 %v502_v11, %v1706_v7  ;;  %v555_v4 = vmul.f32 %v509_v34, %v1965_v39  ;;  %v561_v11 = vmul.f32 %v1670_v51, %v1975_v15  ;;  %v510_v36 = vsub.f32 %v505_v17, %v509_v34 }
  0xf4   : > { %v506_v9 = vmul.f32 %v1966_v43, %v504_v25  ;;  %v520_v33 = vadd.f32 %v505_v17, %v504_v25  ;;  %v556_v49 = vadd.f32 %v555_v4, %v554_v63  ;;  %v1990_v63 = vmax.f32 %v1978_v57, 0.0 }
  0xf6   : > { %v521_v46 = vsub.f32 %v520_v33, %v1969_v13  ;;  %v551_v44 = vmul.f32 %v506_v9, %v1971_v16  ;;  %v557_v59 = vmax.f32 %v556_v49, 0.0 }
  0xf8   : > { %v522_v48 = vadd.f32 %v521_v46, %v503_v26  ;;  %v552_v42 = vadd.f32 %v551_v44, %v550_v32  ;;  %v585_v30 = vsel %vm1597_vm10, %v557_v59, %v1667_v31  }
  0xf9   :  { %618 = vst [vmem:[#allocation3 + $0x50] sm:$0xff] (%p1788_p2), %v585_v30 }
  0xfa   : > { %v523_v53 = vmul.f32 %v1974_v45, %v522_v48  ;;  %v553_v3 = vmax.f32 %v552_v42, 0.0 }
  0xfc   : > { %v524_v8 = vmax.f32 %v523_v53, 0.0  ;;  %v559_v21 = vadd.f32 %v1584_v10, %v553_v3  ;;  %v584_v22 = vsel %vm1597_vm10, %v553_v3, %v1655_v40   ;;  %v507_v10 = vsub.f32 %v504_v25, %v506_v9 }
  0xfd   : > { %v2001_v3 = vmov %v1619_v38  ;;  %615 = vst [vmem:[#allocation3 + $0x48] sm:$0xff] (%p1788_p2), %v584_v22 }
  0xfe   : > { %vm1758_vm13 = vcmp.lt.f32.partialorder %v525_v5, %v524_v8  ;;  %v527_v31 = vmul.f32 %v1137_v18, %v524_v8  ;;  %v560_v60 = vadd.f32 %v559_v21, %v557_v59  ;;  %v508_v46 = vmax.f32 %v507_v10, 0.0 }
  0xff   : > { %v511_v59 = vmax.f32 %v510_v36, 0.0  ;;  %v1994_v10 = vmov %v585_v30  ;;  %v1996_v8 = vmov %v1629_v56 }
 0x100   : > { %v528_v40 = vsel %vm1758_vm13, %v527_v31, %v503_v26  ;;  %v562_v4 = vmul.f32 %v560_v60, %v1990_v63 }
 0x101   : > { %v529_v33 = vsub.f32 %v528_v40, %v503_v26  ;;  %v579_v32 = vsel %vm1597_vm10, %v528_v40, %v1682_v61  }
 0x102   : > { %v563_v49 = vadd.f32 %v562_v4, %v561_v11  ;;  %v2000_v4 = vmov %v579_v32  ;;  %600 = vst [vmem:[#allocation3 + $0x20] sm:$0xff] (%p1788_p2), %v579_v32 }
 0x103   : > { %v530_v51 = vsub.f32 %v504_v25, %v529_v33  ;;  %v533_v44 = vsub.f32 %v529_v33, %v504_v25 }
 0x104   : > { %v565_v9 = vadd.f32 %v564_v1, %v563_v49  ;;  %v2003_v1 = vmov %v1960_v52 }
 0x105   : > { %v531_v48 = vmax.f32 %v530_v51, 0.0  ;;  %v534_v42 = vmax.f32 %v533_v44, 0.0  ;;  %175 = sbr.rel (!%p1788_p2) target bundleno = 38 (0x26), region = 113 }
 0x106   : > { %745 = vst [vmem:[%s1690_s29 + $0x8] sm:$0xff] %v565_v9  ;;  %v586_v53 = vsel %vm1597_vm10, %v565_v9, %v387_v0   ;;  %v1995_v9 = vmov %v584_v22  ;;  %v2004_v0 = vld [vmem:[#allocation41_spill] sm:$0xff] }
 0x107   : > { %v532_v34 = vsel %vm1758_vm13, %v531_v48, %v508_v46  ;;  %v535_v26 = vsub.f32 %v505_v17, %v534_v42  ;;  %v1993_v11 = vmov %v586_v53  ;;  %621 = vst [vmem:[#allocation3 + $0x58] sm:$0xff] (%p1788_p2), %v586_v53 }
 0x108   : > { %v580_v61 = vsel %vm1597_vm10, %v532_v34, %v1706_v7   ;;  %v1997_v7 = vmov %v1624_v54 }
 0x109   : > { %v536_v5 = vsel %vm1758_vm13, %v535_v26, %v511_v59  ;;  %603 = vst [vmem:[#allocation3 + $0x28] sm:$0xff] (%p1788_p2), %v580_v61 }
 0x10a   : > { %v581_v25 = vsel %vm1597_vm10, %v536_v5, %v1715_v55   ;;  %v1999_v5 = vmov %v580_v61  ;;  %v2005_v55 = vld [vmem:[#allocation41_spill] sm:$0xff] (%p1788_p2) }
 0x10b   : > { %v1998_v6 = vmov %v581_v25  ;;  %588 = vst [vmem:[#allocation3] sm:$0xff] (%p1788_p2), %v2005_v55  ;;  %606 = vst [vmem:[#allocation3 + $0x30] sm:$0xff] (%p1788_p2), %v581_v25 }
 0x10c   :  { %895 = shalt.err (!%p892_p7)
}
 0x10d   :  { %s896_s5 = scalar_lea.hbm %s1850_s6, 1536 }
 0x10e   :  { %p897_p8 = scmp.ne.s32.totalorder %s1850_s6, %s896_s5  ;;  %p900_p9 = scmp.lt.u32.totalorder %s896_s5, %s1850_s6 }
 0x110   :  { %p902_p10 = pnand %p900_p9, %p897_p8 }
 0x112   :  { %905 = shalt.err (!%p902_p10)
}
 0x113   :  { %s1013_s2 = smov 128   ;;  %s1014_s13 = smov 8  }
 0x114   :  { %637 = dma.vmem_to_hbm [thread:$0]  %s632_s8, 1536, %s1850_s6, [#allocation4], %s1013_s2, %s1013_s2, %s1014_s13  }
 0x115   :  { %958 = dma.done.wait [#allocation4], 1536  }
 0x116   :  { %959 = vsyncadd [#allocation4], 4294965760 }
 0x117   :  { %645 = vsyncpa [#allocation4], 1 }

</bundles_post_ra>
